<compile_context>
chip_gen: v7x
topology: tpu7x:2x2x1
jax: 0.10.0
libtpu: 0.0.40
codegen_flags: <defaults>
</compile_context>

<pallas_src>
import math

import jax
import jax.numpy as jnp
from jax.experimental import pallas as pl
from jax.experimental.pallas import tpu as pltpu

CLASS_NAMES = ["class_a", "class_b", "class_c", "class_d", "class_e"]
NUM_CLASSES = len(CLASS_NAMES)

LANE = 128          # lane-dense padded output channel count for conv stages
TM_CONV = 1024      # max row tile for conv GEMMs (bf16 patches -> small tiles)
TM_FC = 256         # max row (batch) tile for the fused conv3+FC head


def _round_up(x, m):
    return (x + m - 1) // m * m


def _cdiv(a, b):
    return -(-a // b)


def _pick_tile(m, tmax):
    """Row tile (multiple of 8) aiming for >= 2 grid steps (v7x has 2 TCs)."""
    m_pad = _round_up(max(m, 8), 8)
    n_steps = max(2, _cdiv(m_pad, tmax))
    tm = _round_up(_cdiv(m_pad, n_steps), 8)
    m_pad = _round_up(m_pad, tm)
    return tm, m_pad


# ---------------------------------------------------------------------------
# Pallas kernels
# ---------------------------------------------------------------------------
def _conv_pool_kernel(p_ref, w_ref, b_ref, o_ref):
    """Fused conv-as-GEMM + 2x2 max-pool + bias + ReLU.

    p_ref: [4, tm, K] bf16 (one im2col patch matrix per pooling corner).
    max over the 4 corner GEMMs is taken BEFORE bias+ReLU (monotonic, so
    relu(max(d)+b) == max(relu(d_i+b)) == pool(relu(conv)))."""
    w = w_ref[...]
    d = jnp.dot(p_ref[0], w, preferred_element_type=jnp.float32)
    for c in range(1, 4):
        d = jnp.maximum(d, jnp.dot(p_ref[c], w, preferred_element_type=jnp.float32))
    o_ref[...] = jnp.maximum(d + b_ref[...], 0.0).astype(o_ref.dtype)


def _conv3_fc_kernel(p_ref, wc_ref, bc_ref, w1_ref, b1_ref, w2_ref, b2_ref,
                     w3_ref, b3_ref, o_ref):
    """Fused conv3+ReLU+pool -> fc1+ReLU -> fc2+ReLU -> fc3 -> log_softmax.

    p_ref: [4*R, tb, K] bf16 conv3 corner patches, leading index = c*R + r
           (c = pooling corner, r = pooled spatial position, rows = batch).
    w1_ref: [R, OC, H1] fc1 weight regrouped per spatial position so the
           NCHW torch.flatten semantics are reproduced without any reshape."""
    R = w1_ref.shape[0]
    wc = wc_ref[...]
    bc = bc_ref[...]
    acc = None
    for r in range(R):
        d = jnp.dot(p_ref[r], wc, preferred_element_type=jnp.float32)
        for c in range(1, 4):
            d = jnp.maximum(
                d, jnp.dot(p_ref[c * R + r], wc, preferred_element_type=jnp.float32))
        a = jnp.maximum(d + bc, 0.0)                       # pooled conv3 act at r
        t = jnp.dot(a, w1_ref[r], preferred_element_type=jnp.float32)
        acc = t if acc is None else acc + t
    h = jnp.maximum(acc + b1_ref[...], 0.0)
    h = jnp.maximum(
        jnp.dot(h, w2_ref[...], preferred_element_type=jnp.float32) + b2_ref[...], 0.0)
    y = jnp.dot(h, w3_ref[...], preferred_element_type=jnp.float32) + b3_ref[...]
    m = jnp.max(y, axis=-1, keepdims=True)
    lse = m + jnp.log(jnp.sum(jnp.exp(y - m), axis=-1, keepdims=True))
    o_ref[...] = (y - lse).astype(o_ref.dtype)


# ---------------------------------------------------------------------------
# im2col of the four pooling corners (XLA layout glue only)
# ---------------------------------------------------------------------------
def _corner_patches(x, k, s, dh, dw, ph, pw, ic):
    """x: [B,H,W] (IC=1) or [B,H,W,Cpad] -> [B, ph, pw, k*k, ic] patches for
    pooling corner (dh, dw).  Last-dim ordering is (kh, kw, ic)."""
    cols = []
    for kh in range(k):
        for kw in range(k):
            h0 = dh * s + kh
            w0 = dw * s + kw
            sl = x[:, h0: h0 + 2 * s * (ph - 1) + 1: 2 * s,
                      w0: w0 + 2 * s * (pw - 1) + 1: 2 * s]
            sl = sl[..., :ic] if x.ndim == 4 else sl[..., None]
            cols.append(sl)                               # [B, ph, pw, ic]
    return jnp.stack(cols, axis=3)                        # [B, ph, pw, k*k, ic]


def _conv_weight_mat(w, pad_to=None):
    """[OC, IC, KH, KW] -> [KH*KW*IC, OC] (optionally lane-padded)."""
    OC, IC, KH, KW = w.shape
    wmat = jnp.transpose(w, (2, 3, 1, 0)).reshape(KH * KW * IC, OC)
    if pad_to is not None and pad_to > OC:
        wmat = jnp.pad(wmat, ((0, 0), (0, pad_to - OC)))
    return wmat


# ---------------------------------------------------------------------------
# Fused Conv2d + ReLU + MaxPool2d(2,2) stage (conv1, conv2)
# ---------------------------------------------------------------------------
def conv_relu_pool(x, w, b, stride):
    """x: [B,H,W] or [B,H,W,Cpad] (only first IC channels real); w: [OC,IC,KH,KW].
    Returns pooled NHWC map [B, PH, PW, LANE] (channels OC..LANE are zero)."""
    B, H, W = x.shape[0], x.shape[1], x.shape[2]
    OC, IC, KH, KW = w.shape
    OH = (H - KH) // stride + 1
    OW = (W - KW) // stride + 1
    PH, PW = OH // 2, OW // 2              # MaxPool2d(2,2), floor mode
    M = B * PH * PW
    K = KH * KW * IC

    corners = jnp.stack(
        [_corner_patches(x, KH, stride, dh, dw, PH, PW, IC).reshape(M, K)
         for dh in (0, 1) for dw in (0, 1)], axis=0)       # [4, M, K]

    tm, m_pad = _pick_tile(M, TM_CONV)
    if m_pad > M:
        corners = jnp.pad(corners, ((0, 0), (0, m_pad - M), (0, 0)))
    corners = corners.astype(jnp.bfloat16)

    wmat = _conv_weight_mat(w, pad_to=LANE).astype(jnp.bfloat16)
    bvec = jnp.pad(b, (0, LANE - OC)).reshape(1, LANE).astype(jnp.float32)

    cost = pl.CostEstimate(
        flops=4 * 2 * m_pad * K * LANE,
        transcendentals=0,
        bytes_accessed=2 * (4 * m_pad * K + K * LANE) + 4 * (LANE + m_pad * LANE),
    )
    out = pl.pallas_call(
        _conv_pool_kernel,
        out_shape=jax.ShapeDtypeStruct((m_pad, LANE), jnp.float32),
        grid=(m_pad // tm,),
        in_specs=[
            pl.BlockSpec((4, tm, K), lambda i: (0, i, 0)),
            pl.BlockSpec((K, LANE), lambda i: (0, 0)),
            pl.BlockSpec((1, LANE), lambda i: (0, 0)),
        ],
        out_specs=pl.BlockSpec((tm, LANE), lambda i: (i, 0)),
        compiler_params=pltpu.CompilerParams(dimension_semantics=("parallel",)),
        cost_estimate=cost,
    )(corners, wmat, bvec)

    return out[:M].reshape(B, PH, PW, LANE)


# ---------------------------------------------------------------------------
# Fused conv3+ReLU+pool + fc1+ReLU + fc2+ReLU + fc3 + log_softmax
# ---------------------------------------------------------------------------
def conv3_fc_head(x, cw, cb, f1w, f1b, f2w, f2b, f3w, f3b):
    """x: [B, H, W, Cpad] NHWC (first IC channels real).  Returns [B, NUM_CLASSES]."""
    B, H, W = x.shape[0], x.shape[1], x.shape[2]
    OC, IC, KH, KW = cw.shape
    OH, OW = H - KH + 1, W - KW + 1        # stride 1
    PH, PW = OH // 2, OW // 2
    R = PH * PW
    K = KH * KW * IC
    H1, H2, NC = f1w.shape[1], f2w.shape[1], f3w.shape[1]

    tb, b_pad = _pick_tile(B, TM_FC)

    def grouped(dh, dw):
        p = _corner_patches(x, KH, 1, dh, dw, PH, PW, IC)   # [B, PH, PW, kk, IC]
        p = jnp.transpose(p, (1, 2, 0, 3, 4)).reshape(R, B, K)
        if b_pad > B:
            p = jnp.pad(p, ((0, 0), (0, b_pad - B), (0, 0)))
        return p                                            # [R, b_pad, K]

    patches = jnp.stack([grouped(dh, dw) for dh in (0, 1) for dw in (0, 1)],
                        axis=0).reshape(4 * R, b_pad, K).astype(jnp.bfloat16)

    wc = _conv_weight_mat(cw).astype(jnp.bfloat16)          # [K, OC]
    bc = cb.reshape(1, OC).astype(jnp.float32)
    # torch.flatten(NCHW) orders features (c, h, w); regroup fc1 rows by
    # spatial position r = h*PW + w so the fused head needs no reshape.
    w1g = f1w.reshape(OC, PH, PW, H1).transpose(1, 2, 0, 3).reshape(R, OC, H1)

    cost = pl.CostEstimate(
        flops=2 * b_pad * (4 * R * K * OC + R * OC * H1 + H1 * H2 + H2 * NC),
        transcendentals=b_pad * (NC + 1),
        bytes_accessed=2 * (4 * R * b_pad * K + K * OC)
        + 4 * (OC + R * OC * H1 + H1 + H1 * H2 + H2 + H2 * NC + NC + b_pad * NC),
    )
    out = pl.pallas_call(
        _conv3_fc_kernel,
        out_shape=jax.ShapeDtypeStruct((b_pad, NC), jnp.float32),
        grid=(b_pad // tb,),
        in_specs=[
            pl.BlockSpec((4 * R, tb, K), lambda i: (0, i, 0)),
            pl.BlockSpec((K, OC), lambda i: (0, 0)),
            pl.BlockSpec((1, OC), lambda i: (0, 0)),
            pl.BlockSpec((R, OC, H1), lambda i: (0, 0, 0)),
            pl.BlockSpec((1, H1), lambda i: (0, 0)),
            pl.BlockSpec((H1, H2), lambda i: (0, 0)),
            pl.BlockSpec((1, H2), lambda i: (0, 0)),
            pl.BlockSpec((H2, NC), lambda i: (0, 0)),
            pl.BlockSpec((1, NC), lambda i: (0, 0)),
        ],
        out_specs=pl.BlockSpec((tb, NC), lambda i: (i, 0)),
        compiler_params=pltpu.CompilerParams(dimension_semantics=("parallel",)),
        cost_estimate=cost,
    )(patches, wc, bc, w1g, f1b.reshape(1, -1), f2w, f2b.reshape(1, -1),
      f3w, f3b.reshape(1, -1))
    return out[:B]


# ---------------------------------------------------------------------------
# Parameters (deterministic, PyTorch-style uniform(-1/sqrt(fan_in), ...))
# ---------------------------------------------------------------------------
def init_params(key):
    def uni(k, fan_in, w_shape, b_shape):
        k1, k2 = jax.random.split(k)
        bound = 1.0 / math.sqrt(fan_in)
        w = jax.random.uniform(k1, w_shape, jnp.float32, -bound, bound)
        b = jax.random.uniform(k2, b_shape, jnp.float32, -bound, bound)
        return w, b

    keys = jax.random.split(key, 6)
    conv1 = uni(keys[0], 1 * 5 * 5, (6, 1, 5, 5), (6,))
    conv2 = uni(keys[1], 6 * 3 * 3, (12, 6, 3, 3), (12,))
    conv3 = uni(keys[2], 12 * 3 * 3, (18, 12, 3, 3), (18,))
    fc1 = uni(keys[3], 18 * 2 * 2, (18 * 2 * 2, 120), (120,))  # stored [in, out]
    fc2 = uni(keys[4], 120, (120, 84), (84,))
    fc3 = uni(keys[5], 84, (84, NUM_CLASSES), (NUM_CLASSES,))
    return conv1, conv2, conv3, fc1, fc2, fc3


# ---------------------------------------------------------------------------
# Full forward pass (matches Cellface_Net.forward)
# ---------------------------------------------------------------------------
def cellface_net(params, x):
    (c1w, c1b), (c2w, c2b), (c3w, c3b), (f1w, f1b), (f2w, f2b), (f3w, f3b) = params
    # conv1 gathers directly from the [B,100,100] (W-in-lanes) view — no NHWC
    # transpose needed for the largest spatial stage (IC = 1).
    y = conv_relu_pool(x[:, 0], c1w, c1b, stride=3)       # [B, 16, 16, 128] (6 real)
    y = conv_relu_pool(y, c2w, c2b, stride=1)             # [B, 7, 7, 128]  (12 real)
    # conv3 + pool + fc1/fc2/fc3 + log_softmax fused into a single kernel.
    return conv3_fc_head(y, c3w, c3b, f1w, f1b, f2w, f2b, f3w, f3b)


# ---------------------------------------------------------------------------
# Pure-JAX reference (structural sanity check only)
# ---------------------------------------------------------------------------
def _reference_forward(params, x):
    (c1w, c1b), (c2w, c2b), (c3w, c3b), (f1w, f1b), (f2w, f2b), (f3w, f3b) = params

    def conv(x, w, b, s):
        y = jax.lax.conv_general_dilated(
            x, w, (s, s), "VALID", dimension_numbers=("NCHW", "OIHW", "NCHW"))
        return jax.nn.relu(y + b.reshape(1, -1, 1, 1))

    def pool(x):
        B, C, H, W = x.shape
        x = x[:, :, : H // 2 * 2, : W // 2 * 2].reshape(B, C, H // 2, 2, W // 2, 2)
        return x.max(axis=(3, 5))

    x = pool(conv(x, c1w, c1b, 3))
    x = pool(conv(x, c2w, c2b, 1))
    x = pool(conv(x, c3w, c3b, 1))
    x = x.reshape(x.shape[0], -1)
    x = jax.nn.relu(x @ f1w + f1b)
    x = jax.nn.relu(x @ f2w + f2b)
    x = x @ f3w + f3b
    return jax.nn.log_softmax(x, axis=-1)


if __name__ == "__main__":
    key = jax.random.PRNGKey(0)
    pkey, xkey = jax.random.split(key)
    params = init_params(pkey)
    # 100x100 input is what the module's 18*2*2 flatten implies.
    x = jax.random.normal(xkey, (2, 1, 100, 100), jnp.float32)

    out = jax.jit(cellface_net)(params, x)
    out = jax.block_until_ready(out)
    assert out.shape == (2, NUM_CLASSES)

    ref = jax.block_until_ready(jax.jit(_reference_forward)(params, x))
    assert bool(jnp.max(jnp.abs(out - ref)) < 5e-2), "mismatch vs reference"
    assert bool(jnp.allclose(jnp.exp(out).sum(axis=-1), 1.0, atol=1e-3))

    print("KERNEL_OK")
</pallas_src>

<mosaic_0001>
module attributes {stable_mosaic.version = 11 : i64} {
  func.func @_conv_pool_kernel(%arg0: i32, %arg1: memref<4x256x25xbf16, #tpu.memory_space<vmem>>, %arg2: memref<25x128xbf16, #tpu.memory_space<vmem>>, %arg3: memref<1x128xf32, #tpu.memory_space<vmem>>, %arg4: memref<256x128xf32, #tpu.memory_space<vmem>>) attributes {dimension_semantics = [#tpu.dimension_semantics<parallel>], iteration_bounds = array<i64: 2>, scalar_prefetch = 0 : i64, scratch_operands = 0 : i64, tpu.core_type = #tpu.core_type<tc>, window_params = [{transform_indices = @transform_0, window_bounds = array<i64: 4, 256, 25>}, {pipeline_mode = #tpu.pipeline_mode<synchronous>, transform_indices = @transform_1, window_bounds = array<i64: 25, 128>}, {pipeline_mode = #tpu.pipeline_mode<synchronous>, transform_indices = @transform_2, window_bounds = array<i64: 1, 128>}, {transform_indices = @transform_3, window_bounds = array<i64: 256, 128>}]} {
    %c0 = arith.constant 0 : index
    %c0_0 = arith.constant 0 : index
    %0 = vector.load %arg2[%c0, %c0_0] : memref<25x128xbf16, #tpu.memory_space<vmem>>, vector<25x128xbf16>
    %c0_1 = arith.constant 0 : index
    %c0_2 = arith.constant 0 : index
    %c0_3 = arith.constant 0 : index
    %1 = vector.load %arg1[%c0_1, %c0_2, %c0_3] : memref<4x256x25xbf16, #tpu.memory_space<vmem>>, vector<1x256x25xbf16>
    %2 = vector.shape_cast %1 : vector<1x256x25xbf16> to vector<256x25xbf16>
    %cst = arith.constant dense<0.000000e+00> : vector<256x128xf32>
    %3 = tpu.matmul %2, %0, %cst {dimension_numbers = #tpu.dot_dimension_numbers<[1], [0], [0], [1], [0, 0, 1, 1], [], []>} : vector<256x25xbf16>, vector<25x128xbf16>, vector<256x128xf32> -> vector<256x128xf32>
    %c1 = arith.constant 1 : index
    %c0_4 = arith.constant 0 : index
    %c0_5 = arith.constant 0 : index
    %4 = vector.load %arg1[%c1, %c0_4, %c0_5] : memref<4x256x25xbf16, #tpu.memory_space<vmem>>, vector<1x256x25xbf16>
    %5 = vector.shape_cast %4 : vector<1x256x25xbf16> to vector<256x25xbf16>
    %cst_6 = arith.constant dense<0.000000e+00> : vector<256x128xf32>
    %6 = tpu.matmul %5, %0, %cst_6 {dimension_numbers = #tpu.dot_dimension_numbers<[1], [0], [0], [1], [0, 0, 1, 1], [], []>} : vector<256x25xbf16>, vector<25x128xbf16>, vector<256x128xf32> -> vector<256x128xf32>
    %7 = arith.maximumf %3, %6 : vector<256x128xf32>
    %c2 = arith.constant 2 : index
    %c0_7 = arith.constant 0 : index
    %c0_8 = arith.constant 0 : index
    %8 = vector.load %arg1[%c2, %c0_7, %c0_8] : memref<4x256x25xbf16, #tpu.memory_space<vmem>>, vector<1x256x25xbf16>
    %9 = vector.shape_cast %8 : vector<1x256x25xbf16> to vector<256x25xbf16>
    %cst_9 = arith.constant dense<0.000000e+00> : vector<256x128xf32>
    %10 = tpu.matmul %9, %0, %cst_9 {dimension_numbers = #tpu.dot_dimension_numbers<[1], [0], [0], [1], [0, 0, 1, 1], [], []>} : vector<256x25xbf16>, vector<25x128xbf16>, vector<256x128xf32> -> vector<256x128xf32>
    %11 = arith.maximumf %7, %10 : vector<256x128xf32>
    %c3 = arith.constant 3 : index
    %c0_10 = arith.constant 0 : index
    %c0_11 = arith.constant 0 : index
    %12 = vector.load %arg1[%c3, %c0_10, %c0_11] : memref<4x256x25xbf16, #tpu.memory_space<vmem>>, vector<1x256x25xbf16>
    %13 = vector.shape_cast %12 : vector<1x256x25xbf16> to vector<256x25xbf16>
    %cst_12 = arith.constant dense<0.000000e+00> : vector<256x128xf32>
    %14 = tpu.matmul %13, %0, %cst_12 {dimension_numbers = #tpu.dot_dimension_numbers<[1], [0], [0], [1], [0, 0, 1, 1], [], []>} : vector<256x25xbf16>, vector<25x128xbf16>, vector<256x128xf32> -> vector<256x128xf32>
    %15 = arith.maximumf %11, %14 : vector<256x128xf32>
    %c0_13 = arith.constant 0 : index
    %c0_14 = arith.constant 0 : index
    %16 = vector.load %arg3[%c0_13, %c0_14] : memref<1x128xf32, #tpu.memory_space<vmem>>, vector<1x128xf32>
    %17 = vector.broadcast %16 : vector<1x128xf32> to vector<256x128xf32>
    %18 = arith.addf %15, %17 : vector<256x128xf32>
    %cst_15 = arith.constant 0.000000e+00 : f32
    %19 = vector.broadcast %cst_15 : f32 to vector<256x128xf32>
    %20 = arith.maximumf %18, %19 : vector<256x128xf32>
    %c0_16 = arith.constant 0 : index
    %c0_17 = arith.constant 0 : index
    %21 = vector.load %arg4[%c0_16, %c0_17] : memref<256x128xf32, #tpu.memory_space<vmem>>, vector<256x128xf32>
    tpu.vector_store %arg4[%c0_16, %c0_17], %20 {strides = array<i32>} : memref<256x128xf32, #tpu.memory_space<vmem>>, vector<256x128xf32>,
    return
  }
  func.func @transform_0(%arg0: i32) -> (i32, i32, i32) {
    %c0_i32 = arith.constant 0 : i32
    %c0_i32_0 = arith.constant 0 : i32
    %c0_i32_1 = arith.constant 0 : i32
    return %c0_i32, %arg0, %c0_i32_0 : i32, i32, i32
  }
  func.func @transform_1(%arg0: i32) -> (i32, i32) {
    %c0_i32 = arith.constant 0 : i32
    %c0_i32_0 = arith.constant 0 : i32
    %c0_i32_1 = arith.constant 0 : i32
    return %c0_i32, %c0_i32_0 : i32, i32
  }
  func.func @transform_2(%arg0: i32) -> (i32, i32) {
    %c0_i32 = arith.constant 0 : i32
    %c0_i32_0 = arith.constant 0 : i32
    %c0_i32_1 = arith.constant 0 : i32
    return %c0_i32, %c0_i32_0 : i32, i32
  }
  func.func @transform_3(%arg0: i32) -> (i32, i32) {
    %c0_i32 = arith.constant 0 : i32
    %c0_i32_0 = arith.constant 0 : i32
    return %arg0, %c0_i32 : i32, i32
  }
}

module attributes {stable_mosaic.version = 11 : i64} {
  func.func @_conv_pool_kernel(%arg0: i32, %arg1: memref<4x56x54xbf16, #tpu.memory_space<vmem>>, %arg2: memref<54x128xbf16, #tpu.memory_space<vmem>>, %arg3: memref<1x128xf32, #tpu.memory_space<vmem>>, %arg4: memref<56x128xf32, #tpu.memory_space<vmem>>) attributes {dimension_semantics = [#tpu.dimension_semantics<parallel>], iteration_bounds = array<i64: 2>, scalar_prefetch = 0 : i64, scratch_operands = 0 : i64, tpu.core_type = #tpu.core_type<tc>, window_params = [{transform_indices = @transform_0, window_bounds = array<i64: 4, 56, 54>}, {pipeline_mode = #tpu.pipeline_mode<synchronous>, transform_indices = @transform_1, window_bounds = array<i64: 54, 128>}, {pipeline_mode = #tpu.pipeline_mode<synchronous>, transform_indices = @transform_2, window_bounds = array<i64: 1, 128>}, {transform_indices = @transform_3, window_bounds = array<i64: 56, 128>}]} {
    %c0 = arith.constant 0 : index
    %c0_0 = arith.constant 0 : index
    %0 = vector.load %arg2[%c0, %c0_0] : memref<54x128xbf16, #tpu.memory_space<vmem>>, vector<54x128xbf16>
    %c0_1 = arith.constant 0 : index
    %c0_2 = arith.constant 0 : index
    %c0_3 = arith.constant 0 : index
    %1 = vector.load %arg1[%c0_1, %c0_2, %c0_3] : memref<4x56x54xbf16, #tpu.memory_space<vmem>>, vector<1x56x54xbf16>
    %2 = vector.shape_cast %1 : vector<1x56x54xbf16> to vector<56x54xbf16>
    %cst = arith.constant dense<0.000000e+00> : vector<56x128xf32>
    %3 = tpu.matmul %2, %0, %cst {dimension_numbers = #tpu.dot_dimension_numbers<[1], [0], [0], [1], [0, 0, 1, 1], [], []>} : vector<56x54xbf16>, vector<54x128xbf16>, vector<56x128xf32> -> vector<56x128xf32>
    %c1 = arith.constant 1 : index
    %c0_4 = arith.constant 0 : index
    %c0_5 = arith.constant 0 : index
    %4 = vector.load %arg1[%c1, %c0_4, %c0_5] : memref<4x56x54xbf16, #tpu.memory_space<vmem>>, vector<1x56x54xbf16>
    %5 = vector.shape_cast %4 : vector<1x56x54xbf16> to vector<56x54xbf16>
    %cst_6 = arith.constant dense<0.000000e+00> : vector<56x128xf32>
    %6 = tpu.matmul %5, %0, %cst_6 {dimension_numbers = #tpu.dot_dimension_numbers<[1], [0], [0], [1], [0, 0, 1, 1], [], []>} : vector<56x54xbf16>, vector<54x128xbf16>, vector<56x128xf32> -> vector<56x128xf32>
    %7 = arith.maximumf %3, %6 : vector<56x128xf32>
    %c2 = arith.constant 2 : index
    %c0_7 = arith.constant 0 : index
    %c0_8 = arith.constant 0 : index
    %8 = vector.load %arg1[%c2, %c0_7, %c0_8] : memref<4x56x54xbf16, #tpu.memory_space<vmem>>, vector<1x56x54xbf16>
    %9 = vector.shape_cast %8 : vector<1x56x54xbf16> to vector<56x54xbf16>
    %cst_9 = arith.constant dense<0.000000e+00> : vector<56x128xf32>
    %10 = tpu.matmul %9, %0, %cst_9 {dimension_numbers = #tpu.dot_dimension_numbers<[1], [0], [0], [1], [0, 0, 1, 1], [], []>} : vector<56x54xbf16>, vector<54x128xbf16>, vector<56x128xf32> -> vector<56x128xf32>
    %11 = arith.maximumf %7, %10 : vector<56x128xf32>
    %c3 = arith.constant 3 : index
    %c0_10 = arith.constant 0 : index
    %c0_11 = arith.constant 0 : index
    %12 = vector.load %arg1[%c3, %c0_10, %c0_11] : memref<4x56x54xbf16, #tpu.memory_space<vmem>>, vector<1x56x54xbf16>
    %13 = vector.shape_cast %12 : vector<1x56x54xbf16> to vector<56x54xbf16>
    %cst_12 = arith.constant dense<0.000000e+00> : vector<56x128xf32>
    %14 = tpu.matmul %13, %0, %cst_12 {dimension_numbers = #tpu.dot_dimension_numbers<[1], [0], [0], [1], [0, 0, 1, 1], [], []>} : vector<56x54xbf16>, vector<54x128xbf16>, vector<56x128xf32> -> vector<56x128xf32>
    %15 = arith.maximumf %11, %14 : vector<56x128xf32>
    %c0_13 = arith.constant 0 : index
    %c0_14 = arith.constant 0 : index
    %16 = vector.load %arg3[%c0_13, %c0_14] : memref<1x128xf32, #tpu.memory_space<vmem>>, vector<1x128xf32>
    %17 = vector.broadcast %16 : vector<1x128xf32> to vector<56x128xf32>
    %18 = arith.addf %15, %17 : vector<56x128xf32>
    %cst_15 = arith.constant 0.000000e+00 : f32
    %19 = vector.broadcast %cst_15 : f32 to vector<56x128xf32>
    %20 = arith.maximumf %18, %19 : vector<56x128xf32>
    %c0_16 = arith.constant 0 : index
    %c0_17 = arith.constant 0 : index
    %21 = vector.load %arg4[%c0_16, %c0_17] : memref<56x128xf32, #tpu.memory_space<vmem>>, vector<56x128xf32>
    tpu.vector_store %arg4[%c0_16, %c0_17], %20 {strides = array<i32>} : memref<56x128xf32, #tpu.memory_space<vmem>>, vector<56x128xf32>,
    return
  }
  func.func @transform_0(%arg0: i32) -> (i32, i32, i32) {
    %c0_i32 = arith.constant 0 : i32
    %c0_i32_0 = arith.constant 0 : i32
    %c0_i32_1 = arith.constant 0 : i32
    return %c0_i32, %arg0, %c0_i32_0 : i32, i32, i32
  }
  func.func @transform_1(%arg0: i32) -> (i32, i32) {
    %c0_i32 = arith.constant 0 : i32
    %c0_i32_0 = arith.constant 0 : i32
    %c0_i32_1 = arith.constant 0 : i32
    return %c0_i32, %c0_i32_0 : i32, i32
  }
  func.func @transform_2(%arg0: i32) -> (i32, i32) {
    %c0_i32 = arith.constant 0 : i32
    %c0_i32_0 = arith.constant 0 : i32
    %c0_i32_1 = arith.constant 0 : i32
    return %c0_i32, %c0_i32_0 : i32, i32
  }
  func.func @transform_3(%arg0: i32) -> (i32, i32) {
    %c0_i32 = arith.constant 0 : i32
    %c0_i32_0 = arith.constant 0 : i32
    return %arg0, %c0_i32 : i32, i32
  }
}

module attributes {stable_mosaic.version = 11 : i64} {
  func.func @_conv3_fc_kernel(%arg0: i32, %arg1: memref<16x8x108xbf16, #tpu.memory_space<vmem>>, %arg2: memref<108x18xbf16, #tpu.memory_space<vmem>>, %arg3: memref<1x18xf32, #tpu.memory_space<vmem>>, %arg4: memref<4x18x120xf32, #tpu.memory_space<vmem>>, %arg5: memref<1x120xf32, #tpu.memory_space<vmem>>, %arg6: memref<120x84xf32, #tpu.memory_space<vmem>>, %arg7: memref<1x84xf32, #tpu.memory_space<vmem>>, %arg8: memref<84x5xf32, #tpu.memory_space<vmem>>, %arg9: memref<1x5xf32, #tpu.memory_space<vmem>>, %arg10: memref<8x5xf32, #tpu.memory_space<vmem>>) attributes {dimension_semantics = [#tpu.dimension_semantics<parallel>], iteration_bounds = array<i64: 1>, scalar_prefetch = 0 : i64, scratch_operands = 0 : i64, tpu.core_type = #tpu.core_type<tc>, window_params = [{transform_indices = @transform_0, window_bounds = array<i64: 16, 8, 108>}, {pipeline_mode = #tpu.pipeline_mode<synchronous>, transform_indices = @transform_1, window_bounds = array<i64: 108, 18>}, {pipeline_mode = #tpu.pipeline_mode<synchronous>, transform_indices = @transform_2, window_bounds = array<i64: 1, 18>}, {pipeline_mode = #tpu.pipeline_mode<synchronous>, transform_indices = @transform_3, window_bounds = array<i64: 4, 18, 120>}, {pipeline_mode = #tpu.pipeline_mode<synchronous>, transform_indices = @transform_4, window_bounds = array<i64: 1, 120>}, {pipeline_mode = #tpu.pipeline_mode<synchronous>, transform_indices = @transform_5, window_bounds = array<i64: 120, 84>}, {pipeline_mode = #tpu.pipeline_mode<synchronous>, transform_indices = @transform_6, window_bounds = array<i64: 1, 84>}, {pipeline_mode = #tpu.pipeline_mode<synchronous>, transform_indices = @transform_7, window_bounds = array<i64: 84, 5>}, {pipeline_mode = #tpu.pipeline_mode<synchronous>, transform_indices = @transform_8, window_bounds = array<i64: 1, 5>}, {transform_indices = @transform_9, window_bounds = array<i64: 8, 5>}]} {
    %c0 = arith.constant 0 : index
    %c0_0 = arith.constant 0 : index
    %0 = vector.load %arg2[%c0, %c0_0] : memref<108x18xbf16, #tpu.memory_space<vmem>>, vector<108x18xbf16>
    %c0_1 = arith.constant 0 : index
    %c0_2 = arith.constant 0 : index
    %1 = vector.load %arg3[%c0_1, %c0_2] : memref<1x18xf32, #tpu.memory_space<vmem>>, vector<1x18xf32>
    %c0_3 = arith.constant 0 : index
    %c0_4 = arith.constant 0 : index
    %c0_5 = arith.constant 0 : index
    %2 = vector.load %arg1[%c0_3, %c0_4, %c0_5] : memref<16x8x108xbf16, #tpu.memory_space<vmem>>, vector<1x8x108xbf16>
    %3 = vector.shape_cast %2 : vector<1x8x108xbf16> to vector<8x108xbf16>
    %cst = arith.constant dense<0.000000e+00> : vector<8x18xf32>
    %4 = tpu.matmul %3, %0, %cst {dimension_numbers = #tpu.dot_dimension_numbers<[1], [0], [0], [1], [0, 0, 1, 1], [], []>} : vector<8x108xbf16>, vector<108x18xbf16>, vector<8x18xf32> -> vector<8x18xf32>
    %c4 = arith.constant 4 : index
    %c0_6 = arith.constant 0 : index
    %c0_7 = arith.constant 0 : index
    %5 = vector.load %arg1[%c4, %c0_6, %c0_7] : memref<16x8x108xbf16, #tpu.memory_space<vmem>>, vector<1x8x108xbf16>
    %6 = vector.shape_cast %5 : vector<1x8x108xbf16> to vector<8x108xbf16>
    %cst_8 = arith.constant dense<0.000000e+00> : vector<8x18xf32>
    %7 = tpu.matmul %6, %0, %cst_8 {dimension_numbers = #tpu.dot_dimension_numbers<[1], [0], [0], [1], [0, 0, 1, 1], [], []>} : vector<8x108xbf16>, vector<108x18xbf16>, vector<8x18xf32> -> vector<8x18xf32>
    %8 = arith.maximumf %4, %7 : vector<8x18xf32>
    %c8 = arith.constant 8 : index
    %c0_9 = arith.constant 0 : index
    %c0_10 = arith.constant 0 : index
    %9 = vector.load %arg1[%c8, %c0_9, %c0_10] : memref<16x8x108xbf16, #tpu.memory_space<vmem>>, vector<1x8x108xbf16>
    %10 = vector.shape_cast %9 : vector<1x8x108xbf16> to vector<8x108xbf16>
    %cst_11 = arith.constant dense<0.000000e+00> : vector<8x18xf32>
    %11 = tpu.matmul %10, %0, %cst_11 {dimension_numbers = #tpu.dot_dimension_numbers<[1], [0], [0], [1], [0, 0, 1, 1], [], []>} : vector<8x108xbf16>, vector<108x18xbf16>, vector<8x18xf32> -> vector<8x18xf32>
    %12 = arith.maximumf %8, %11 : vector<8x18xf32>
    %c12 = arith.constant 12 : index
    %c0_12 = arith.constant 0 : index
    %c0_13 = arith.constant 0 : index
    %13 = vector.load %arg1[%c12, %c0_12, %c0_13] : memref<16x8x108xbf16, #tpu.memory_space<vmem>>, vector<1x8x108xbf16>
    %14 = vector.shape_cast %13 : vector<1x8x108xbf16> to vector<8x108xbf16>
    %cst_14 = arith.constant dense<0.000000e+00> : vector<8x18xf32>
    %15 = tpu.matmul %14, %0, %cst_14 {dimension_numbers = #tpu.dot_dimension_numbers<[1], [0], [0], [1], [0, 0, 1, 1], [], []>} : vector<8x108xbf16>, vector<108x18xbf16>, vector<8x18xf32> -> vector<8x18xf32>
    %16 = arith.maximumf %12, %15 : vector<8x18xf32>
    %17 = vector.broadcast %1 : vector<1x18xf32> to vector<8x18xf32>
    %18 = arith.addf %16, %17 : vector<8x18xf32>
    %cst_15 = arith.constant 0.000000e+00 : f32
    %19 = vector.broadcast %cst_15 : f32 to vector<8x18xf32>
    %20 = arith.maximumf %18, %19 : vector<8x18xf32>
    %c0_16 = arith.constant 0 : index
    %c0_17 = arith.constant 0 : index
    %c0_18 = arith.constant 0 : index
    %21 = vector.load %arg4[%c0_16, %c0_17, %c0_18] : memref<4x18x120xf32, #tpu.memory_space<vmem>>, vector<1x18x120xf32>
    %22 = vector.shape_cast %21 : vector<1x18x120xf32> to vector<18x120xf32>
    %cst_19 = arith.constant dense<0.000000e+00> : vector<8x120xf32>
    %23 = tpu.matmul %20, %22, %cst_19 {dimension_numbers = #tpu.dot_dimension_numbers<[1], [0], [0], [1], [0, 0, 1, 1], [], []>} : vector<8x18xf32>, vector<18x120xf32>, vector<8x120xf32> -> vector<8x120xf32>
    %c1 = arith.constant 1 : index
    %c0_20 = arith.constant 0 : index
    %c0_21 = arith.constant 0 : index
    %24 = vector.load %arg1[%c1, %c0_20, %c0_21] : memref<16x8x108xbf16, #tpu.memory_space<vmem>>, vector<1x8x108xbf16>
    %25 = vector.shape_cast %24 : vector<1x8x108xbf16> to vector<8x108xbf16>
    %cst_22 = arith.constant dense<0.000000e+00> : vector<8x18xf32>
    %26 = tpu.matmul %25, %0, %cst_22 {dimension_numbers = #tpu.dot_dimension_numbers<[1], [0], [0], [1], [0, 0, 1, 1], [], []>} : vector<8x108xbf16>, vector<108x18xbf16>, vector<8x18xf32> -> vector<8x18xf32>
    %c5 = arith.constant 5 : index
    %c0_23 = arith.constant 0 : index
    %c0_24 = arith.constant 0 : index
    %27 = vector.load %arg1[%c5, %c0_23, %c0_24] : memref<16x8x108xbf16, #tpu.memory_space<vmem>>, vector<1x8x108xbf16>
    %28 = vector.shape_cast %27 : vector<1x8x108xbf16> to vector<8x108xbf16>
    %cst_25 = arith.constant dense<0.000000e+00> : vector<8x18xf32>
    %29 = tpu.matmul %28, %0, %cst_25 {dimension_numbers = #tpu.dot_dimension_numbers<[1], [0], [0], [1], [0, 0, 1, 1], [], []>} : vector<8x108xbf16>, vector<108x18xbf16>, vector<8x18xf32> -> vector<8x18xf32>
    %30 = arith.maximumf %26, %29 : vector<8x18xf32>
    %c9 = arith.constant 9 : index
    %c0_26 = arith.constant 0 : index
    %c0_27 = arith.constant 0 : index
    %31 = vector.load %arg1[%c9, %c0_26, %c0_27] : memref<16x8x108xbf16, #tpu.memory_space<vmem>>, vector<1x8x108xbf16>
    %32 = vector.shape_cast %31 : vector<1x8x108xbf16> to vector<8x108xbf16>
    %cst_28 = arith.constant dense<0.000000e+00> : vector<8x18xf32>
    %33 = tpu.matmul %32, %0, %cst_28 {dimension_numbers = #tpu.dot_dimension_numbers<[1], [0], [0], [1], [0, 0, 1, 1], [], []>} : vector<8x108xbf16>, vector<108x18xbf16>, vector<8x18xf32> -> vector<8x18xf32>
    %34 = arith.maximumf %30, %33 : vector<8x18xf32>
    %c13 = arith.constant 13 : index
    %c0_29 = arith.constant 0 : index
    %c0_30 = arith.constant 0 : index
    %35 = vector.load %arg1[%c13, %c0_29, %c0_30] : memref<16x8x108xbf16, #tpu.memory_space<vmem>>, vector<1x8x108xbf16>
    %36 = vector.shape_cast %35 : vector<1x8x108xbf16> to vector<8x108xbf16>
    %cst_31 = arith.constant dense<0.000000e+00> : vector<8x18xf32>
    %37 = tpu.matmul %36, %0, %cst_31 {dimension_numbers = #tpu.dot_dimension_numbers<[1], [0], [0], [1], [0, 0, 1, 1], [], []>} : vector<8x108xbf16>, vector<108x18xbf16>, vector<8x18xf32> -> vector<8x18xf32>
    %38 = arith.maximumf %34, %37 : vector<8x18xf32>
    %39 = vector.broadcast %1 : vector<1x18xf32> to vector<8x18xf32>
    %40 = arith.addf %38, %39 : vector<8x18xf32>
    %cst_32 = arith.constant 0.000000e+00 : f32
    %41 = vector.broadcast %cst_32 : f32 to vector<8x18xf32>
    %42 = arith.maximumf %40, %41 : vector<8x18xf32>
    %c1_33 = arith.constant 1 : index
    %c0_34 = arith.constant 0 : index
    %c0_35 = arith.constant 0 : index
    %43 = vector.load %arg4[%c1_33, %c0_34, %c0_35] : memref<4x18x120xf32, #tpu.memory_space<vmem>>, vector<1x18x120xf32>
    %44 = vector.shape_cast %43 : vector<1x18x120xf32> to vector<18x120xf32>
    %cst_36 = arith.constant dense<0.000000e+00> : vector<8x120xf32>
    %45 = tpu.matmul %42, %44, %cst_36 {dimension_numbers = #tpu.dot_dimension_numbers<[1], [0], [0], [1], [0, 0, 1, 1], [], []>} : vector<8x18xf32>, vector<18x120xf32>, vector<8x120xf32> -> vector<8x120xf32>
    %46 = arith.addf %23, %45 : vector<8x120xf32>
    %c2 = arith.constant 2 : index
    %c0_37 = arith.constant 0 : index
    %c0_38 = arith.constant 0 : index
    %47 = vector.load %arg1[%c2, %c0_37, %c0_38] : memref<16x8x108xbf16, #tpu.memory_space<vmem>>, vector<1x8x108xbf16>
    %48 = vector.shape_cast %47 : vector<1x8x108xbf16> to vector<8x108xbf16>
    %cst_39 = arith.constant dense<0.000000e+00> : vector<8x18xf32>
    %49 = tpu.matmul %48, %0, %cst_39 {dimension_numbers = #tpu.dot_dimension_numbers<[1], [0], [0], [1], [0, 0, 1, 1], [], []>} : vector<8x108xbf16>, vector<108x18xbf16>, vector<8x18xf32> -> vector<8x18xf32>
    %c6 = arith.constant 6 : index
    %c0_40 = arith.constant 0 : index
    %c0_41 = arith.constant 0 : index
    %50 = vector.load %arg1[%c6, %c0_40, %c0_41] : memref<16x8x108xbf16, #tpu.memory_space<vmem>>, vector<1x8x108xbf16>
    %51 = vector.shape_cast %50 : vector<1x8x108xbf16> to vector<8x108xbf16>
    %cst_42 = arith.constant dense<0.000000e+00> : vector<8x18xf32>
    %52 = tpu.matmul %51, %0, %cst_42 {dimension_numbers = #tpu.dot_dimension_numbers<[1], [0], [0], [1], [0, 0, 1, 1], [], []>} : vector<8x108xbf16>, vector<108x18xbf16>, vector<8x18xf32> -> vector<8x18xf32>
    %53 = arith.maximumf %49, %52 : vector<8x18xf32>
    %c10 = arith.constant 10 : index
    %c0_43 = arith.constant 0 : index
    %c0_44 = arith.constant 0 : index
    %54 = vector.load %arg1[%c10, %c0_43, %c0_44] : memref<16x8x108xbf16, #tpu.memory_space<vmem>>, vector<1x8x108xbf16>
    %55 = vector.shape_cast %54 : vector<1x8x108xbf16> to vector<8x108xbf16>
    %cst_45 = arith.constant dense<0.000000e+00> : vector<8x18xf32>
    %56 = tpu.matmul %55, %0, %cst_45 {dimension_numbers = #tpu.dot_dimension_numbers<[1], [0], [0], [1], [0, 0, 1, 1], [], []>} : vector<8x108xbf16>, vector<108x18xbf16>, vector<8x18xf32> -> vector<8x18xf32>
    %57 = arith.maximumf %53, %56 : vector<8x18xf32>
    %c14 = arith.constant 14 : index
    %c0_46 = arith.constant 0 : index
    %c0_47 = arith.constant 0 : index
    %58 = vector.load %arg1[%c14, %c0_46, %c0_47] : memref<16x8x108xbf16, #tpu.memory_space<vmem>>, vector<1x8x108xbf16>
    %59 = vector.shape_cast %58 : vector<1x8x108xbf16> to vector<8x108xbf16>
    %cst_48 = arith.constant dense<0.000000e+00> : vector<8x18xf32>
    %60 = tpu.matmul %59, %0, %cst_48 {dimension_numbers = #tpu.dot_dimension_numbers<[1], [0], [0], [1], [0, 0, 1, 1], [], []>} : vector<8x108xbf16>, vector<108x18xbf16>, vector<8x18xf32> -> vector<8x18xf32>
    %61 = arith.maximumf %57, %60 : vector<8x18xf32>
    %62 = vector.broadcast %1 : vector<1x18xf32> to vector<8x18xf32>
    %63 = arith.addf %61, %62 : vector<8x18xf32>
    %cst_49 = arith.constant 0.000000e+00 : f32
    %64 = vector.broadcast %cst_49 : f32 to vector<8x18xf32>
    %65 = arith.maximumf %63, %64 : vector<8x18xf32>
    %c2_50 = arith.constant 2 : index
    %c0_51 = arith.constant 0 : index
    %c0_52 = arith.constant 0 : index
    %66 = vector.load %arg4[%c2_50, %c0_51, %c0_52] : memref<4x18x120xf32, #tpu.memory_space<vmem>>, vector<1x18x120xf32>
    %67 = vector.shape_cast %66 : vector<1x18x120xf32> to vector<18x120xf32>
    %cst_53 = arith.constant dense<0.000000e+00> : vector<8x120xf32>
    %68 = tpu.matmul %65, %67, %cst_53 {dimension_numbers = #tpu.dot_dimension_numbers<[1], [0], [0], [1], [0, 0, 1, 1], [], []>} : vector<8x18xf32>, vector<18x120xf32>, vector<8x120xf32> -> vector<8x120xf32>
    %69 = arith.addf %46, %68 : vector<8x120xf32>
    %c3 = arith.constant 3 : index
    %c0_54 = arith.constant 0 : index
    %c0_55 = arith.constant 0 : index
    %70 = vector.load %arg1[%c3, %c0_54, %c0_55] : memref<16x8x108xbf16, #tpu.memory_space<vmem>>, vector<1x8x108xbf16>
    %71 = vector.shape_cast %70 : vector<1x8x108xbf16> to vector<8x108xbf16>
    %cst_56 = arith.constant dense<0.000000e+00> : vector<8x18xf32>
    %72 = tpu.matmul %71, %0, %cst_56 {dimension_numbers = #tpu.dot_dimension_numbers<[1], [0], [0], [1], [0, 0, 1, 1], [], []>} : vector<8x108xbf16>, vector<108x18xbf16>, vector<8x18xf32> -> vector<8x18xf32>
    %c7 = arith.constant 7 : index
    %c0_57 = arith.constant 0 : index
    %c0_58 = arith.constant 0 : index
    %73 = vector.load %arg1[%c7, %c0_57, %c0_58] : memref<16x8x108xbf16, #tpu.memory_space<vmem>>, vector<1x8x108xbf16>
    %74 = vector.shape_cast %73 : vector<1x8x108xbf16> to vector<8x108xbf16>
    %cst_59 = arith.constant dense<0.000000e+00> : vector<8x18xf32>
    %75 = tpu.matmul %74, %0, %cst_59 {dimension_numbers = #tpu.dot_dimension_numbers<[1], [0], [0], [1], [0, 0, 1, 1], [], []>} : vector<8x108xbf16>, vector<108x18xbf16>, vector<8x18xf32> -> vector<8x18xf32>
    %76 = arith.maximumf %72, %75 : vector<8x18xf32>
    %c11 = arith.constant 11 : index
    %c0_60 = arith.constant 0 : index
    %c0_61 = arith.constant 0 : index
    %77 = vector.load %arg1[%c11, %c0_60, %c0_61] : memref<16x8x108xbf16, #tpu.memory_space<vmem>>, vector<1x8x108xbf16>
    %78 = vector.shape_cast %77 : vector<1x8x108xbf16> to vector<8x108xbf16>
    %cst_62 = arith.constant dense<0.000000e+00> : vector<8x18xf32>
    %79 = tpu.matmul %78, %0, %cst_62 {dimension_numbers = #tpu.dot_dimension_numbers<[1], [0], [0], [1], [0, 0, 1, 1], [], []>} : vector<8x108xbf16>, vector<108x18xbf16>, vector<8x18xf32> -> vector<8x18xf32>
    %80 = arith.maximumf %76, %79 : vector<8x18xf32>
    %c15 = arith.constant 15 : index
    %c0_63 = arith.constant 0 : index
    %c0_64 = arith.constant 0 : index
    %81 = vector.load %arg1[%c15, %c0_63, %c0_64] : memref<16x8x108xbf16, #tpu.memory_space<vmem>>, vector<1x8x108xbf16>
    %82 = vector.shape_cast %81 : vector<1x8x108xbf16> to vector<8x108xbf16>
    %cst_65 = arith.constant dense<0.000000e+00> : vector<8x18xf32>
    %83 = tpu.matmul %82, %0, %cst_65 {dimension_numbers = #tpu.dot_dimension_numbers<[1], [0], [0], [1], [0, 0, 1, 1], [], []>} : vector<8x108xbf16>, vector<108x18xbf16>, vector<8x18xf32> -> vector<8x18xf32>
    %84 = arith.maximumf %80, %83 : vector<8x18xf32>
    %85 = vector.broadcast %1 : vector<1x18xf32> to vector<8x18xf32>
    %86 = arith.addf %84, %85 : vector<8x18xf32>
    %cst_66 = arith.constant 0.000000e+00 : f32
    %87 = vector.broadcast %cst_66 : f32 to vector<8x18xf32>
    %88 = arith.maximumf %86, %87 : vector<8x18xf32>
    %c3_67 = arith.constant 3 : index
    %c0_68 = arith.constant 0 : index
    %c0_69 = arith.constant 0 : index
    %89 = vector.load %arg4[%c3_67, %c0_68, %c0_69] : memref<4x18x120xf32, #tpu.memory_space<vmem>>, vector<1x18x120xf32>
    %90 = vector.shape_cast %89 : vector<1x18x120xf32> to vector<18x120xf32>
    %cst_70 = arith.constant dense<0.000000e+00> : vector<8x120xf32>
    %91 = tpu.matmul %88, %90, %cst_70 {dimension_numbers = #tpu.dot_dimension_numbers<[1], [0], [0], [1], [0, 0, 1, 1], [], []>} : vector<8x18xf32>, vector<18x120xf32>, vector<8x120xf32> -> vector<8x120xf32>
    %92 = arith.addf %69, %91 : vector<8x120xf32>
    %c0_71 = arith.constant 0 : index
    %c0_72 = arith.constant 0 : index
    %93 = vector.load %arg5[%c0_71, %c0_72] : memref<1x120xf32, #tpu.memory_space<vmem>>, vector<1x120xf32>
    %94 = vector.broadcast %93 : vector<1x120xf32> to vector<8x120xf32>
    %95 = arith.addf %92, %94 : vector<8x120xf32>
    %cst_73 = arith.constant 0.000000e+00 : f32
    %96 = vector.broadcast %cst_73 : f32 to vector<8x120xf32>
    %97 = arith.maximumf %95, %96 : vector<8x120xf32>
    %c0_74 = arith.constant 0 : index
    %c0_75 = arith.constant 0 : index
    %98 = vector.load %arg6[%c0_74, %c0_75] : memref<120x84xf32, #tpu.memory_space<vmem>>, vector<120x84xf32>
    %cst_76 = arith.constant dense<0.000000e+00> : vector<8x84xf32>
    %99 = tpu.matmul %97, %98, %cst_76 {dimension_numbers = #tpu.dot_dimension_numbers<[1], [0], [0], [1], [0, 0, 1, 1], [], []>} : vector<8x120xf32>, vector<120x84xf32>, vector<8x84xf32> -> vector<8x84xf32>
    %c0_77 = arith.constant 0 : index
    %c0_78 = arith.constant 0 : index
    %100 = vector.load %arg7[%c0_77, %c0_78] : memref<1x84xf32, #tpu.memory_space<vmem>>, vector<1x84xf32>
    %101 = vector.broadcast %100 : vector<1x84xf32> to vector<8x84xf32>
    %102 = arith.addf %99, %101 : vector<8x84xf32>
    %cst_79 = arith.constant 0.000000e+00 : f32
    %103 = vector.broadcast %cst_79 : f32 to vector<8x84xf32>
    %104 = arith.maximumf %102, %103 : vector<8x84xf32>
    %c0_80 = arith.constant 0 : index
    %c0_81 = arith.constant 0 : index
    %105 = vector.load %arg8[%c0_80, %c0_81] : memref<84x5xf32, #tpu.memory_space<vmem>>, vector<84x5xf32>
    %cst_82 = arith.constant dense<0.000000e+00> : vector<8x5xf32>
    %106 = tpu.matmul %104, %105, %cst_82 {dimension_numbers = #tpu.dot_dimension_numbers<[1], [0], [0], [1], [0, 0, 1, 1], [], []>} : vector<8x84xf32>, vector<84x5xf32>, vector<8x5xf32> -> vector<8x5xf32>
    %c0_83 = arith.constant 0 : index
    %c0_84 = arith.constant 0 : index
    %107 = vector.load %arg9[%c0_83, %c0_84] : memref<1x5xf32, #tpu.memory_space<vmem>>, vector<1x5xf32>
    %108 = vector.broadcast %107 : vector<1x5xf32> to vector<8x5xf32>
    %109 = arith.addf %106, %108 : vector<8x5xf32>
    %cst_85 = arith.constant dense<0xFF800000> : vector<8xf32>
    %110 = vector.multi_reduction <maximumf>, %109, %cst_85 [1] : vector<8x5xf32> to vector<8xf32>
    %111 = vector.shape_cast %110 : vector<8xf32> to vector<8x1xf32>
    %112 = vector.broadcast %111 : vector<8x1xf32> to vector<8x5xf32>
    %113 = arith.subf %109, %112 : vector<8x5xf32>
    %114 = math.exp %113 : vector<8x5xf32>
    %cst_86 = arith.constant dense<0.000000e+00> : vector<8xf32>
    %115 = vector.multi_reduction <add>, %114, %cst_86 [1] : vector<8x5xf32> to vector<8xf32>
    %116 = vector.shape_cast %115 : vector<8xf32> to vector<8x1xf32>
    %117 = math.log %116 : vector<8x1xf32>
    %118 = arith.addf %111, %117 : vector<8x1xf32>
    %119 = vector.broadcast %118 : vector<8x1xf32> to vector<8x5xf32>
    %120 = arith.subf %109, %119 : vector<8x5xf32>
    %c0_87 = arith.constant 0 : index
    %c0_88 = arith.constant 0 : index
    %121 = vector.load %arg10[%c0_87, %c0_88] : memref<8x5xf32, #tpu.memory_space<vmem>>, vector<8x5xf32>
    tpu.vector_store %arg10[%c0_87, %c0_88], %120 {strides = array<i32>} : memref<8x5xf32, #tpu.memory_space<vmem>>, vector<8x5xf32>,
    return
  }
  func.func @transform_0(%arg0: i32) -> (i32, i32, i32) {
    %c0_i32 = arith.constant 0 : i32
    %c0_i32_0 = arith.constant 0 : i32
    %c0_i32_1 = arith.constant 0 : i32
    return %c0_i32, %arg0, %c0_i32_0 : i32, i32, i32
  }
  func.func @transform_1(%arg0: i32) -> (i32, i32) {
    %c0_i32 = arith.constant 0 : i32
    %c0_i32_0 = arith.constant 0 : i32
    %c0_i32_1 = arith.constant 0 : i32
    return %c0_i32, %c0_i32_0 : i32, i32
  }
  func.func @transform_2(%arg0: i32) -> (i32, i32) {
    %c0_i32 = arith.constant 0 : i32
    %c0_i32_0 = arith.constant 0 : i32
    %c0_i32_1 = arith.constant 0 : i32
    return %c0_i32, %c0_i32_0 : i32, i32
  }
  func.func @transform_3(%arg0: i32) -> (i32, i32, i32) {
    %c0_i32 = arith.constant 0 : i32
    %c0_i32_0 = arith.constant 0 : i32
    %c0_i32_1 = arith.constant 0 : i32
    %c0_i32_2 = arith.constant 0 : i32
    return %c0_i32, %c0_i32_0, %c0_i32_1 : i32, i32, i32
  }
  func.func @transform_4(%arg0: i32) -> (i32, i32) {
    %c0_i32 = arith.constant 0 : i32
    %c0_i32_0 = arith.constant 0 : i32
    %c0_i32_1 = arith.constant 0 : i32
    return %c0_i32, %c0_i32_0 : i32, i32
  }
  func.func @transform_5(%arg0: i32) -> (i32, i32) {
    %c0_i32 = arith.constant 0 : i32
    %c0_i32_0 = arith.constant 0 : i32
    %c0_i32_1 = arith.constant 0 : i32
    return %c0_i32, %c0_i32_0 : i32, i32
  }
  func.func @transform_6(%arg0: i32) -> (i32, i32) {
    %c0_i32 = arith.constant 0 : i32
    %c0_i32_0 = arith.constant 0 : i32
    %c0_i32_1 = arith.constant 0 : i32
    return %c0_i32, %c0_i32_0 : i32, i32
  }
  func.func @transform_7(%arg0: i32) -> (i32, i32) {
    %c0_i32 = arith.constant 0 : i32
    %c0_i32_0 = arith.constant 0 : i32
    %c0_i32_1 = arith.constant 0 : i32
    return %c0_i32, %c0_i32_0 : i32, i32
  }
  func.func @transform_8(%arg0: i32) -> (i32, i32) {
    %c0_i32 = arith.constant 0 : i32
    %c0_i32_0 = arith.constant 0 : i32
    %c0_i32_1 = arith.constant 0 : i32
    return %c0_i32, %c0_i32_0 : i32, i32
  }
  func.func @transform_9(%arg0: i32) -> (i32, i32) {
    %c0_i32 = arith.constant 0 : i32
    %c0_i32_0 = arith.constant 0 : i32
    return %arg0, %c0_i32 : i32, i32
  }
}

</mosaic_0001>

<bundles_post_ra>
// kernel: cellface_net.3
= control target key start
LH: loop header
LB: loop body
LE: loop exit
PB: predicated region body
PF: predicated region fallthrough
CT: control target
= control target key end

     0   :  { %s2888_s12 = smov 0   ;;  %s2890_s13 = smov 0   ;;  %s3567_s0 = inlined_call_operand.vmem [shape: bf16[4,512,25], index: 0, kind: input, shape index: {}]   ;;  %s3568_s1 = inlined_call_operand.vmem [shape: bf16[25,128], index: 1, kind: input, shape index: {}]   ;;  %s3569_s2 = inlined_call_operand.vmem [shape: f32[1,128], index: 2, kind: input, shape index: {}]   ;;  %s3570_s3 = inlined_call_operand.vmem [shape: f32[512,128], index: 3, kind: output, shape index: {}]  }
   0x1   :  { %s2892_s14 = smov 0  }
   0x2 LB: > { %s2295_s15 = sadd.s32 4294967295, %s2865_s14   ;;  %s2905_s16 = sadd.s32 1, %s2865_s14   ;;  %s2865_s14 = sphi %s2892_s14, %s3656_s14   ;;  %s2861_s13 = sphi %s2890_s13, %s3655_s13   ;;  %s2857_s12 = sphi %s2888_s12, %s3654_s12  }
   0x3   : > { %s17_s17 = ssub.s32 %s2865_s14, %s2905_s16  ;;  %s20_s18 = sadd.s32 1, %s2861_s13 }
   0x4   : > { %p18_p0 = scmp.eq.s32.totalorder %s17_s17, 0  ;;  %p27_p1 = scmp.ne.s32.totalorder %s2861_s13, %s2857_s12 }
   0x5   : > { %p28_p2 = scmp.eq.s32.totalorder %s2865_s14, 0  ;;  %p2298_p4 = scmp.ge.s32.totalorder %s2865_s14, 2 }
   0x6   : > { %s2914_s19 = scalar_select %p18_p0, %s2861_s13, %s20_s18  }
   0x7   : > { %p29_p3 = por %p28_p2, %p27_p1  ;;  %127 = sbr.rel (%p2298_p4) target bundleno = 50 (0x32), region = 24 }
   0xe   : > { %130 = sbr.rel (!%p29_p3) target bundleno = 50 (0x32), region = 28  ;;  %s132_s20 = sand.u32 (%p29_p3), 1, %s2861_s13  }
   0xf   : > { %s2535_s21 = sshll.u32 (%p29_p3), %s2865_s14, 7  ;;  %s2299_s22 = sshll.u32 (%p29_p3), %s132_s20, 9 }
  0x10   : > { %s2922_s25 = scalar_lea.vmem (%p29_p3), %s3567_s0, %s2535_s21  ;;  %s2927_s26 = scalar_lea.vmem (%p29_p3), [#allocation2], %s2299_s22 }
  0x11   : > { %v153_v0 = vld [vmem:[%s2922_s25] sm:$0xff] (%p29_p3)   ;;  %v157_v1 = vld [vmem:[%s2922_s25 + $0x8] sm:$0xff] (%p29_p3)   ;;  %v161_v2 = vld [vmem:[%s2922_s25 + $0x10] sm:$0xff] (%p29_p3)  }
  0x12   : > { %154 = vst [vmem:[%s2927_s26] sm:$0xff] (%p29_p3), %v153_v0   ;;  %158 = vst [vmem:[%s2927_s26 + $0x8] sm:$0xff] (%p29_p3), %v157_v1   ;;  %v165_v3 = vld [vmem:[%s2922_s25 + $0x18] sm:$0xff] (%p29_p3)   ;;  %v169_v4 = vld [vmem:[%s2922_s25 + $0x20] sm:$0xff] (%p29_p3)  }
  0x13   : > { %162 = vst [vmem:[%s2927_s26 + $0x10] sm:$0xff] (%p29_p3), %v161_v2   ;;  %v173_v5 = vld [vmem:[%s2922_s25 + $0x28] sm:$0xff] (%p29_p3)   ;;  %166 = vst [vmem:[%s2927_s26 + $0x18] sm:$0xff] (%p29_p3), %v165_v3   ;;  %v177_v6 = vld [vmem:[%s2922_s25 + $0x30] sm:$0xff] (%p29_p3)  }
  0x14   : > { %170 = vst [vmem:[%s2927_s26 + $0x20] sm:$0xff] (%p29_p3), %v169_v4   ;;  %174 = vst [vmem:[%s2927_s26 + $0x28] sm:$0xff] (%p29_p3), %v173_v5   ;;  %v181_v7 = vld [vmem:[%s2922_s25 + $0x38] sm:$0xff] (%p29_p3)   ;;  %v185_v8 = vld [vmem:[%s2922_s25 + $0x40] sm:$0xff] (%p29_p3)  }
  0x15   : > { %178 = vst [vmem:[%s2927_s26 + $0x30] sm:$0xff] %v177_v6   ;;  %182 = vst [vmem:[%s2927_s26 + $0x38] sm:$0xff] %v181_v7   ;;  %v189_v9 = vld [vmem:[%s2922_s25 + $0x48] sm:$0xff]   ;;  %v193_v10 = vld [vmem:[%s2922_s25 + $0x50] sm:$0xff]  }
  0x16   : > { %186 = vst [vmem:[%s2927_s26 + $0x40] sm:$0xff] %v185_v8   ;;  %v197_v11 = vld [vmem:[%s2922_s25 + $0x58] sm:$0xff]   ;;  %190 = vst [vmem:[%s2927_s26 + $0x48] sm:$0xff] %v189_v9   ;;  %v201_v12 = vld [vmem:[%s2922_s25 + $0x60] sm:$0xff]  }
  0x17   : > { %194 = vst [vmem:[%s2927_s26 + $0x50] sm:$0xff] %v193_v10   ;;  %198 = vst [vmem:[%s2927_s26 + $0x58] sm:$0xff] %v197_v11   ;;  %v205_v13 = vld [vmem:[%s2922_s25 + $0x68] sm:$0xff]   ;;  %v209_v14 = vld [vmem:[%s2922_s25 + $0x70] sm:$0xff]  }
  0x18   : > { %202 = vst [vmem:[%s2927_s26 + $0x60] sm:$0xff] %v201_v12   ;;  %206 = vst [vmem:[%s2927_s26 + $0x68] sm:$0xff] %v205_v13   ;;  %v213_v15 = vld [vmem:[%s2922_s25 + $0x78] sm:$0xff]   ;;  %v217_v16 = vld [vmem:[%s2922_s25 + $0x100] sm:$0xff]  }
  0x19   : > { %210 = vst [vmem:[%s2927_s26 + $0x70] sm:$0xff] %v209_v14   ;;  %v221_v17 = vld [vmem:[%s2922_s25 + $0x108] sm:$0xff]   ;;  %214 = vst [vmem:[%s2927_s26 + $0x78] sm:$0xff] %v213_v15   ;;  %v225_v18 = vld [vmem:[%s2922_s25 + $0x110] sm:$0xff]  }
  0x1a   : > { %218 = vst [vmem:[%s2927_s26 + $0x80] sm:$0xff] %v217_v16   ;;  %222 = vst [vmem:[%s2927_s26 + $0x88] sm:$0xff] %v221_v17   ;;  %v229_v19 = vld [vmem:[%s2922_s25 + $0x118] sm:$0xff]   ;;  %v233_v20 = vld [vmem:[%s2922_s25 + $0x120] sm:$0xff]  }
  0x1b   : > { %226 = vst [vmem:[%s2927_s26 + $0x90] sm:$0xff] %v225_v18   ;;  %230 = vst [vmem:[%s2927_s26 + $0x98] sm:$0xff] %v229_v19   ;;  %v237_v21 = vld [vmem:[%s2922_s25 + $0x128] sm:$0xff]   ;;  %v241_v22 = vld [vmem:[%s2922_s25 + $0x130] sm:$0xff]  }
  0x1c   : > { %234 = vst [vmem:[%s2927_s26 + $0xa0] sm:$0xff] %v233_v20   ;;  %v245_v23 = vld [vmem:[%s2922_s25 + $0x138] sm:$0xff]   ;;  %238 = vst [vmem:[%s2927_s26 + $0xa8] sm:$0xff] %v237_v21   ;;  %v249_v24 = vld [vmem:[%s2922_s25 + $0x140] sm:$0xff]  }
  0x1d   : > { %242 = vst [vmem:[%s2927_s26 + $0xb0] sm:$0xff] %v241_v22   ;;  %246 = vst [vmem:[%s2927_s26 + $0xb8] sm:$0xff] %v245_v23   ;;  %v253_v25 = vld [vmem:[%s2922_s25 + $0x148] sm:$0xff]   ;;  %v257_v26 = vld [vmem:[%s2922_s25 + $0x150] sm:$0xff]  }
  0x1e   : > { %250 = vst [vmem:[%s2927_s26 + $0xc0] sm:$0xff] %v249_v24   ;;  %254 = vst [vmem:[%s2927_s26 + $0xc8] sm:$0xff] %v253_v25   ;;  %v261_v27 = vld [vmem:[%s2922_s25 + $0x158] sm:$0xff]   ;;  %v265_v28 = vld [vmem:[%s2922_s25 + $0x160] sm:$0xff]  }
  0x1f   : > { %258 = vst [vmem:[%s2927_s26 + $0xd0] sm:$0xff] %v257_v26   ;;  %v269_v29 = vld [vmem:[%s2922_s25 + $0x168] sm:$0xff]   ;;  %262 = vst [vmem:[%s2927_s26 + $0xd8] sm:$0xff] %v261_v27   ;;  %v273_v30 = vld [vmem:[%s2922_s25 + $0x170] sm:$0xff]  }
  0x20   : > { %266 = vst [vmem:[%s2927_s26 + $0xe0] sm:$0xff] %v265_v28   ;;  %270 = vst [vmem:[%s2927_s26 + $0xe8] sm:$0xff] %v269_v29   ;;  %v277_v31 = vld [vmem:[%s2922_s25 + $0x178] sm:$0xff]   ;;  %v281_v32 = vld [vmem:[%s2922_s25 + $0x200] sm:$0xff]  }
  0x21   : > { %274 = vst [vmem:[%s2927_s26 + $0xf0] sm:$0xff] %v273_v30   ;;  %278 = vst [vmem:[%s2927_s26 + $0xf8] sm:$0xff] %v277_v31   ;;  %v285_v33 = vld [vmem:[%s2922_s25 + $0x208] sm:$0xff]   ;;  %v289_v34 = vld [vmem:[%s2922_s25 + $0x210] sm:$0xff]  }
  0x22   : > { %282 = vst [vmem:[%s2927_s26 + $0x100] sm:$0xff] %v281_v32   ;;  %v293_v35 = vld [vmem:[%s2922_s25 + $0x218] sm:$0xff]   ;;  %286 = vst [vmem:[%s2927_s26 + $0x108] sm:$0xff] %v285_v33   ;;  %v297_v36 = vld [vmem:[%s2922_s25 + $0x220] sm:$0xff]  }
  0x23   : > { %290 = vst [vmem:[%s2927_s26 + $0x110] sm:$0xff] %v289_v34   ;;  %294 = vst [vmem:[%s2927_s26 + $0x118] sm:$0xff] %v293_v35   ;;  %v301_v37 = vld [vmem:[%s2922_s25 + $0x228] sm:$0xff]   ;;  %v305_v38 = vld [vmem:[%s2922_s25 + $0x230] sm:$0xff]  }
  0x24   : > { %298 = vst [vmem:[%s2927_s26 + $0x120] sm:$0xff] %v297_v36   ;;  %302 = vst [vmem:[%s2927_s26 + $0x128] sm:$0xff] %v301_v37   ;;  %v309_v39 = vld [vmem:[%s2922_s25 + $0x238] sm:$0xff]   ;;  %v313_v40 = vld [vmem:[%s2922_s25 + $0x240] sm:$0xff]  }
  0x25   : > { %306 = vst [vmem:[%s2927_s26 + $0x130] sm:$0xff] %v305_v38   ;;  %v317_v41 = vld [vmem:[%s2922_s25 + $0x248] sm:$0xff]   ;;  %310 = vst [vmem:[%s2927_s26 + $0x138] sm:$0xff] %v309_v39   ;;  %v321_v42 = vld [vmem:[%s2922_s25 + $0x250] sm:$0xff]  }
  0x26   : > { %314 = vst [vmem:[%s2927_s26 + $0x140] sm:$0xff] %v313_v40   ;;  %318 = vst [vmem:[%s2927_s26 + $0x148] sm:$0xff] %v317_v41   ;;  %v325_v43 = vld [vmem:[%s2922_s25 + $0x258] sm:$0xff]   ;;  %v329_v44 = vld [vmem:[%s2922_s25 + $0x260] sm:$0xff]  }
  0x27   : > { %322 = vst [vmem:[%s2927_s26 + $0x150] sm:$0xff] %v321_v42   ;;  %326 = vst [vmem:[%s2927_s26 + $0x158] sm:$0xff] %v325_v43   ;;  %v333_v45 = vld [vmem:[%s2922_s25 + $0x268] sm:$0xff]   ;;  %v337_v46 = vld [vmem:[%s2922_s25 + $0x270] sm:$0xff]  }
  0x28   : > { %330 = vst [vmem:[%s2927_s26 + $0x160] sm:$0xff] %v329_v44   ;;  %v341_v47 = vld [vmem:[%s2922_s25 + $0x278] sm:$0xff]   ;;  %334 = vst [vmem:[%s2927_s26 + $0x168] sm:$0xff] %v333_v45   ;;  %v345_v48 = vld [vmem:[%s2922_s25 + $0x300] sm:$0xff]  }
  0x29   : > { %338 = vst [vmem:[%s2927_s26 + $0x170] sm:$0xff] %v337_v46   ;;  %342 = vst [vmem:[%s2927_s26 + $0x178] sm:$0xff] %v341_v47   ;;  %v349_v49 = vld [vmem:[%s2922_s25 + $0x308] sm:$0xff]   ;;  %v353_v50 = vld [vmem:[%s2922_s25 + $0x310] sm:$0xff]  }
  0x2a   : > { %346 = vst [vmem:[%s2927_s26 + $0x180] sm:$0xff] %v345_v48   ;;  %350 = vst [vmem:[%s2927_s26 + $0x188] sm:$0xff] %v349_v49   ;;  %v357_v51 = vld [vmem:[%s2922_s25 + $0x318] sm:$0xff]   ;;  %v361_v52 = vld [vmem:[%s2922_s25 + $0x320] sm:$0xff]  }
  0x2b   : > { %354 = vst [vmem:[%s2927_s26 + $0x190] sm:$0xff] %v353_v50   ;;  %v365_v53 = vld [vmem:[%s2922_s25 + $0x328] sm:$0xff]   ;;  %358 = vst [vmem:[%s2927_s26 + $0x198] sm:$0xff] %v357_v51   ;;  %v369_v54 = vld [vmem:[%s2922_s25 + $0x330] sm:$0xff]  }
  0x2c   : > { %362 = vst [vmem:[%s2927_s26 + $0x1a0] sm:$0xff] %v361_v52   ;;  %366 = vst [vmem:[%s2927_s26 + $0x1a8] sm:$0xff] %v365_v53   ;;  %v373_v55 = vld [vmem:[%s2922_s25 + $0x338] sm:$0xff]   ;;  %v377_v56 = vld [vmem:[%s2922_s25 + $0x340] sm:$0xff]  }
  0x2d   : > { %370 = vst [vmem:[%s2927_s26 + $0x1b0] sm:$0xff] %v369_v54   ;;  %374 = vst [vmem:[%s2927_s26 + $0x1b8] sm:$0xff] %v373_v55   ;;  %v381_v57 = vld [vmem:[%s2922_s25 + $0x348] sm:$0xff]   ;;  %v385_v58 = vld [vmem:[%s2922_s25 + $0x350] sm:$0xff]  }
  0x2e   : > { %378 = vst [vmem:[%s2927_s26 + $0x1c0] sm:$0xff] %v377_v56   ;;  %v389_v59 = vld [vmem:[%s2922_s25 + $0x358] sm:$0xff]   ;;  %382 = vst [vmem:[%s2927_s26 + $0x1c8] sm:$0xff] %v381_v57   ;;  %v393_v60 = vld [vmem:[%s2922_s25 + $0x360] sm:$0xff]  }
  0x2f   : > { %386 = vst [vmem:[%s2927_s26 + $0x1d0] sm:$0xff] %v385_v58   ;;  %390 = vst [vmem:[%s2927_s26 + $0x1d8] sm:$0xff] %v389_v59   ;;  %v397_v61 = vld [vmem:[%s2922_s25 + $0x368] sm:$0xff]   ;;  %v401_v62 = vld [vmem:[%s2922_s25 + $0x370] sm:$0xff]  }
  0x30   : > { %394 = vst [vmem:[%s2927_s26 + $0x1e0] sm:$0xff] %v393_v60   ;;  %398 = vst [vmem:[%s2927_s26 + $0x1e8] sm:$0xff] %v397_v61   ;;  %v405_v63 = vld [vmem:[%s2922_s25 + $0x378] sm:$0xff]  }
  0x31   : > { %402 = vst [vmem:[%s2927_s26 + $0x1f0] sm:$0xff] %v401_v62   ;;  %406 = vst [vmem:[%s2927_s26 + $0x1f8] sm:$0xff] %v405_v63  }
  0x32 PF: > { %p2302_p5 = scmp.ge.s32.totalorder %s2865_s14, 1  ;;  %p686_p6 = scmp.lt.s32.totalorder %s2865_s14, 3 }
  0x34   : > { %p687_p7 = pnand %p2302_p5, %p686_p6 }
  0x36   : > { %690 = sbr.rel (%p687_p7) target bundleno = 415 (0x19f), region = 69 }
  0x3d   : > { %v2777_v0 = vld [vmem:[%s3568_s1] sm:$0xff]   ;;  %vm900_vm0 = vcmask 1043456   ;;  %v2778_v1 = vld [vmem:[%s3568_s1 + $0x8] sm:$0x1f]   ;;  %vm901_vm1 = vcmask 1044480   ;;  %s693_s4 = sand.u32 1, %s2857_s12  }
  0x3e   : > { %2608 = vmatprep.subr.bf16.mxu0 %v2777_v0  ;;  %2644 = vmatprep.subr.bf16.mxu1 %v2777_v0  ;;  %v2867_v2 = vmov 65535   ;;  %s2303_s5 = sshll.u32 %s693_s4, 9  ;;  %vm851_vm2 = vcmask 203776   ;;  %s2304_s7 = sshll.u32 %s2295_s15, 5 }
  0x3f   : > { %2609 = vmatpush3.bf16.msra.mxu0 %v2777_v0  ;;  %2645 = vmatpush3.bf16.msra.mxu1 %v2777_v0  ;;  %v902_v3 = vsel %vm900_vm0, 4294967295, %v2867_v2  ;;  %s3063_s6 = scalar_lea.vmem [#allocation2], %s2303_s5  ;;  %p718_p8 = scmp.lt.s32.totalorder %s2304_s7, 63 }
  0x40   : > { %v903_v4 = vsel %vm901_vm1, %v902_v3, 0  ;;  %v2779_v6 = vld [vmem:[%s3063_s6] sm:$0xff]   ;;  %v2781_v8 = vld [vmem:[%s3063_s6 + $0x8] sm:$0xff]   ;;  %v2783_v10 = vld [vmem:[%s3063_s6 + $0x10] sm:$0xff]  }
  0x41   : > { %v905_v5 = vand.u32 %v2778_v1, %v903_v4  ;;  %v2780_v7 = vld [vmem:[%s3063_s6 + $0x80] sm:$0xff]   ;;  %v2782_v9 = vld [vmem:[%s3063_s6 + $0x88] sm:$0xff]   ;;  %2612 = vmatprep.mubr.msk.bf16.mxu0 %vm851_vm2, %v2779_v6  ;;  %v2784_v11 = vld [vmem:[%s3063_s6 + $0x90] sm:$0xff]   ;;  %s3658_s7 = smov (!%p718_p8, %s2304_s7), 63 }
  0x42   : > { %2648 = vmatprep.mubr.msk.bf16.mxu1 %vm851_vm2, %v2780_v7  ;;  %v2785_v12 = vld [vmem:[%s3063_s6 + $0x18] sm:$0xff]   ;;  %v2787_v14 = vld [vmem:[%s3063_s6 + $0x20] sm:$0xff]   ;;  %v2789_v16 = vld [vmem:[%s3063_s6 + $0x28] sm:$0xff]   ;;  %s2305_s10 = sshll.u32 %s3658_s7, 3 }
  0x43   : > { %2610 = vmatprep.subr.bf16.mxu0 %v905_v5  ;;  %2646 = vmatprep.subr.bf16.mxu1 %v905_v5  ;;  %v2786_v13 = vld [vmem:[%s3063_s6 + $0x98] sm:$0xff]   ;;  %v2788_v15 = vld [vmem:[%s3063_s6 + $0xa0] sm:$0xff]   ;;  %v2790_v17 = vld [vmem:[%s3063_s6 + $0xa8] sm:$0xff]   ;;  %s3408_s14 = scalar_lea.vmem %s3570_s3, %s2305_s10 }
  0x44   : > { %2611 = vmatpush3.bf16.msra.mxu0 %v905_v5  ;;  %2647 = vmatpush3.bf16.msra.mxu1 %v905_v5  ;;  %v2791_v18 = vld [vmem:[%s3063_s6 + $0x30] sm:$0xff]   ;;  %v2793_v20 = vld [vmem:[%s3063_s6 + $0x38] sm:$0xff]   ;;  %v2795_v22 = vld [vmem:[%s3063_s6 + $0x40] sm:$0xff]  }
  0x45   : > { %2680 = vmatprep.subr.bf16.mxu0 %v2777_v0  ;;  %2716 = vmatprep.subr.bf16.mxu1 %v2777_v0  ;;  %v2792_v19 = vld [vmem:[%s3063_s6 + $0xb0] sm:$0xff]   ;;  %v2794_v21 = vld [vmem:[%s3063_s6 + $0xb8] sm:$0xff]   ;;  %v2796_v23 = vld [vmem:[%s3063_s6 + $0xc0] sm:$0xff]  }
  0x46   : > { %v2797_v24 = vld [vmem:[%s3063_s6 + $0x48] sm:$0xff]   ;;  %v2799_v26 = vld [vmem:[%s3063_s6 + $0x50] sm:$0xff]   ;;  %v2801_v28 = vld [vmem:[%s3063_s6 + $0x58] sm:$0xff]  }
  0x47   : > { %2613 = vmatmul.mubr.msk.bf16.vlgmr.msra.gmra.mrb[0].mxu0 %vm851_vm2, %v2781_v8  ;;  %2649 = vmatmul.mubr.msk.bf16.vlgmr.msra.gmra.mrb[0].mxu1 %vm851_vm2, %v2782_v9  ;;  %v2798_v25 = vld [vmem:[%s3063_s6 + $0xc8] sm:$0xff]   ;;  %v2800_v27 = vld [vmem:[%s3063_s6 + $0xd0] sm:$0xff]   ;;  %v2802_v29 = vld [vmem:[%s3063_s6 + $0xd8] sm:$0xff]  }
  0x48   : > { %2681 = vmatpush3.bf16.msra.mxu0 %v2777_v0  ;;  %2717 = vmatpush3.bf16.msra.mxu1 %v2777_v0  ;;  %v2803_v30 = vld [vmem:[%s3063_s6 + $0x60] sm:$0xff]   ;;  %v2805_v32 = vld [vmem:[%s3063_s6 + $0x68] sm:$0xff]   ;;  %v2807_v34 = vld [vmem:[%s3063_s6 + $0x70] sm:$0xff]  }
  0x49   : > { %2616 = vmatprep.mubr.msk.bf16.mxu0 %vm851_vm2, %v2783_v10  ;;  %2652 = vmatprep.mubr.msk.bf16.mxu1 %vm851_vm2, %v2784_v11  ;;  %v2804_v31 = vld [vmem:[%s3063_s6 + $0xe0] sm:$0xff]   ;;  %v2806_v33 = vld [vmem:[%s3063_s6 + $0xe8] sm:$0xff]   ;;  %v2808_v35 = vld [vmem:[%s3063_s6 + $0xf0] sm:$0xff]  }
  0x4a   : > { %2682 = vmatprep.subr.bf16.mxu0 %v905_v5  ;;  %2718 = vmatprep.subr.bf16.mxu1 %v905_v5  ;;  %v2809_v36 = vld [vmem:[%s3063_s6 + $0x78] sm:$0xff]   ;;  %v2811_v38 = vld [vmem:[%s3063_s6 + $0x100] sm:$0xff]   ;;  %v2813_v40 = vld [vmem:[%s3063_s6 + $0x108] sm:$0xff]  }
  0x4b   : > { %v2810_v37 = vld [vmem:[%s3063_s6 + $0xf8] sm:$0xff]   ;;  %v2812_v39 = vld [vmem:[%s3063_s6 + $0x180] sm:$0xff]   ;;  %v2814_v41 = vld [vmem:[%s3063_s6 + $0x188] sm:$0xff]  }
  0x4c   : > { %2683 = vmatpush3.bf16.msra.mxu0 %v905_v5  ;;  %2719 = vmatpush3.bf16.msra.mxu1 %v905_v5  ;;  %v2815_v42 = vld [vmem:[%s3063_s6 + $0x110] sm:$0xff]   ;;  %v2817_v44 = vld [vmem:[%s3063_s6 + $0x118] sm:$0xff]   ;;  %v2819_v46 = vld [vmem:[%s3063_s6 + $0x120] sm:$0xff]  }
  0x4d   : > { %v2816_v43 = vld [vmem:[%s3063_s6 + $0x190] sm:$0xff]   ;;  %v2818_v45 = vld [vmem:[%s3063_s6 + $0x198] sm:$0xff]   ;;  %v2820_v47 = vld [vmem:[%s3063_s6 + $0x1a0] sm:$0xff]  }
  0x4e   : > { %v2821_v48 = vld [vmem:[%s3063_s6 + $0x128] sm:$0xff]   ;;  %v2823_v50 = vld [vmem:[%s3063_s6 + $0x130] sm:$0xff]   ;;  %v2825_v52 = vld [vmem:[%s3063_s6 + $0x138] sm:$0xff]  }
  0x4f   : > { %2617 = vmatmul.mubr.msk.bf16.gmra.mrb[4].mxu0 %vm851_vm2, %v2785_v12  ;;  %2653 = vmatmul.mubr.msk.bf16.gmra.mrb[4].mxu1 %vm851_vm2, %v2786_v13  ;;  %v2822_v49 = vld [vmem:[%s3063_s6 + $0x1a8] sm:$0xff]   ;;  %v2824_v51 = vld [vmem:[%s3063_s6 + $0x1b0] sm:$0xff]   ;;  %v2826_v53 = vld [vmem:[%s3063_s6 + $0x1b8] sm:$0xff]  }
  0x50   : > { %2620 = vmatprep.mubr.msk.bf16.mxu0 %vm851_vm2, %v2787_v14  ;;  %2656 = vmatprep.mubr.msk.bf16.mxu1 %vm851_vm2, %v2788_v15  ;;  %v2827_v54 = vld [vmem:[%s3063_s6 + $0x140] sm:$0xff]   ;;  %v2829_v56 = vld [vmem:[%s3063_s6 + $0x148] sm:$0xff]   ;;  %v2831_v58 = vld [vmem:[%s3063_s6 + $0x150] sm:$0xff]  }
  0x51   : > { %v2828_v55 = vld [vmem:[%s3063_s6 + $0x1c0] sm:$0xff]   ;;  %v2830_v57 = vld [vmem:[%s3063_s6 + $0x1c8] sm:$0xff]   ;;  %v2832_v59 = vld [vmem:[%s3063_s6 + $0x1d0] sm:$0xff]  }
  0x52   : > { %v2833_v60 = vld [vmem:[%s3063_s6 + $0x158] sm:$0xff]   ;;  %v2835_v62 = vld [vmem:[%s3063_s6 + $0x160] sm:$0xff]   ;;  %v2837_v0 = vld [vmem:[%s3063_s6 + $0x168] sm:$0xff]  }
  0x53   : > { %v2834_v61 = vld [vmem:[%s3063_s6 + $0x1d8] sm:$0xff]   ;;  %v2836_v63 = vld [vmem:[%s3063_s6 + $0x1e0] sm:$0xff]   ;;  %v2838_v1 = vld [vmem:[%s3063_s6 + $0x1e8] sm:$0xff]  }
  0x54   : > { %v2839_v2 = vld [vmem:[%s3063_s6 + $0x170] sm:$0xff]   ;;  %v2841_v4 = vld [vmem:[%s3063_s6 + $0x178] sm:$0xff]  }
  0x55   : > { %v2840_v3 = vld [vmem:[%s3063_s6 + $0x1f0] sm:$0xff]   ;;  %v2842_v5 = vld [vmem:[%s3063_s6 + $0x1f8] sm:$0xff]  }
  0x57   : > { %2621 = vmatmul.mubr.msk.bf16.gmra.mrb[8].mxu0 %vm851_vm2, %v2789_v16  ;;  %2657 = vmatmul.mubr.msk.bf16.gmra.mrb[8].mxu1 %vm851_vm2, %v2790_v17 }
  0x58   : > { %2624 = vmatprep.mubr.msk.bf16.mxu0 %vm851_vm2, %v2791_v18  ;;  %2660 = vmatprep.mubr.msk.bf16.mxu1 %vm851_vm2, %v2792_v19 }
  0x5f   : > { %2625 = vmatmul.mubr.msk.bf16.gmra.mrb[12].mxu0 %vm851_vm2, %v2793_v20  ;;  %2661 = vmatmul.mubr.msk.bf16.gmra.mrb[12].mxu1 %vm851_vm2, %v2794_v21 }
  0x60   : > { %2628 = vmatprep.mubr.msk.bf16.mxu0 %vm851_vm2, %v2795_v22  ;;  %2664 = vmatprep.mubr.msk.bf16.mxu1 %vm851_vm2, %v2796_v23 }
  0x67   : > { %2629 = vmatmul.mubr.msk.bf16.gmra.mrb[16].mxu0 %vm851_vm2, %v2797_v24  ;;  %2665 = vmatmul.mubr.msk.bf16.gmra.mrb[16].mxu1 %vm851_vm2, %v2798_v25 }
  0x68   : > { %2632 = vmatprep.mubr.msk.bf16.mxu0 %vm851_vm2, %v2799_v26  ;;  %2668 = vmatprep.mubr.msk.bf16.mxu1 %vm851_vm2, %v2800_v27 }
  0x6f   : > { %2633 = vmatmul.mubr.msk.bf16.gmra.mrb[20].mxu0 %vm851_vm2, %v2801_v28  ;;  %2669 = vmatmul.mubr.msk.bf16.gmra.mrb[20].mxu1 %vm851_vm2, %v2802_v29 }
  0x70   : > { %2636 = vmatprep.mubr.msk.bf16.mxu0 %vm851_vm2, %v2803_v30  ;;  %2672 = vmatprep.mubr.msk.bf16.mxu1 %vm851_vm2, %v2804_v31 }
  0x77   : > { %2637 = vmatmul.mubr.msk.bf16.gmra.mrb[24].mxu0 %vm851_vm2, %v2805_v32  ;;  %2673 = vmatmul.mubr.msk.bf16.gmra.mrb[24].mxu1 %vm851_vm2, %v2806_v33 }
  0x78   : > { %2640 = vmatprep.mubr.msk.bf16.mxu0 %vm851_vm2, %v2807_v34  ;;  %2676 = vmatprep.mubr.msk.bf16.mxu1 %vm851_vm2, %v2808_v35 }
  0x7f   : > { %2641 = vmatmul.mubr.msk.bf16.gmra.mrb[28].mxu0 %vm851_vm2, %v2809_v36  ;;  %2677 = vmatmul.mubr.msk.bf16.gmra.mrb[28].mxu1 %vm851_vm2, %v2810_v37 }
  0x80   : > { %2684 = vmatprep.mubr.msk.bf16.mxu0 %vm851_vm2, %v2811_v38  ;;  %2720 = vmatprep.mubr.msk.bf16.mxu1 %vm851_vm2, %v2812_v39 }
  0x87   : > { %2685 = vmatmul.mubr.msk.bf16.vlgmr.msra.gmra.mrb[32].mxu0 %vm851_vm2, %v2813_v40  ;;  %2721 = vmatmul.mubr.msk.bf16.vlgmr.msra.gmra.mrb[32].mxu1 %vm851_vm2, %v2814_v41 }
  0x88   : > { %2688 = vmatprep.mubr.msk.bf16.mxu0 %vm851_vm2, %v2815_v42  ;;  %2724 = vmatprep.mubr.msk.bf16.mxu1 %vm851_vm2, %v2816_v43 }
  0x8f   : > { %2689 = vmatmul.mubr.msk.bf16.gmra.mrb[36].mxu0 %vm851_vm2, %v2817_v44  ;;  %2725 = vmatmul.mubr.msk.bf16.gmra.mrb[36].mxu1 %vm851_vm2, %v2818_v45 }
  0x90   : > { %2692 = vmatprep.mubr.msk.bf16.mxu0 %vm851_vm2, %v2819_v46  ;;  %2728 = vmatprep.mubr.msk.bf16.mxu1 %vm851_vm2, %v2820_v47 }
  0x97   : > { %2693 = vmatmul.mubr.msk.bf16.gmra.mrb[40].mxu0 %vm851_vm2, %v2821_v48  ;;  %2729 = vmatmul.mubr.msk.bf16.gmra.mrb[40].mxu1 %vm851_vm2, %v2822_v49 }
  0x98   : > { %2696 = vmatprep.mubr.msk.bf16.mxu0 %vm851_vm2, %v2823_v50  ;;  %2732 = vmatprep.mubr.msk.bf16.mxu1 %vm851_vm2, %v2824_v51 }
  0x9f   : > { %2697 = vmatmul.mubr.msk.bf16.gmra.mrb[44].mxu0 %vm851_vm2, %v2825_v52  ;;  %2733 = vmatmul.mubr.msk.bf16.gmra.mrb[44].mxu1 %vm851_vm2, %v2826_v53 }
  0xa0   : > { %2700 = vmatprep.mubr.msk.bf16.mxu0 %vm851_vm2, %v2827_v54  ;;  %2736 = vmatprep.mubr.msk.bf16.mxu1 %vm851_vm2, %v2828_v55 }
  0xa7   : > { %2701 = vmatmul.mubr.msk.bf16.gmra.mrb[48].mxu0 %vm851_vm2, %v2829_v56  ;;  %2737 = vmatmul.mubr.msk.bf16.gmra.mrb[48].mxu1 %vm851_vm2, %v2830_v57 }
  0xa8   : > { %2704 = vmatprep.mubr.msk.bf16.mxu0 %vm851_vm2, %v2831_v58  ;;  %2740 = vmatprep.mubr.msk.bf16.mxu1 %vm851_vm2, %v2832_v59 }
  0xaf   : > { %2705 = vmatmul.mubr.msk.bf16.gmra.mrb[52].mxu0 %vm851_vm2, %v2833_v60  ;;  %2741 = vmatmul.mubr.msk.bf16.gmra.mrb[52].mxu1 %vm851_vm2, %v2834_v61 }
  0xb0   : > { %2708 = vmatprep.mubr.msk.bf16.mxu0 %vm851_vm2, %v2835_v62  ;;  %2744 = vmatprep.mubr.msk.bf16.mxu1 %vm851_vm2, %v2836_v63  ;;  %v3393_v62 = vld [vmem:[%s3569_s2] ss:$0 sm:$0xff] }
  0xb7   : > { %2709 = vmatmul.mubr.msk.bf16.gmra.mrb[56].mxu0 %vm851_vm2, %v2837_v0  ;;  %2745 = vmatmul.mubr.msk.bf16.gmra.mrb[56].mxu1 %vm851_vm2, %v2838_v1 }
  0xb8   : > { %2712 = vmatprep.mubr.msk.bf16.mxu0 %vm851_vm2, %v2839_v2  ;;  %2748 = vmatprep.mubr.msk.bf16.mxu1 %vm851_vm2, %v2840_v3 }
  0xbf   : > { %2713 = vmatmul.mubr.msk.bf16.gmra.mrb[60].mxu0 %vm851_vm2, %v2841_v4  ;;  %2749 = vmatmul.mubr.msk.bf16.gmra.mrb[60].mxu1 %vm851_vm2, %v2842_v5 }
 0x11a   : > { %v3193_v6 = vpop.f32.mrb[0].mxu0  ;;  %v3195_v7 = vpop.f32.mrb[0].mxu1 }
 0x11b   : > { %v3199_v9 = vpop.f32.mrb[1].mxu0  ;;  %v3201_v10 = vpop.f32.mrb[1].mxu1  ;;  %v3605_v4 = vmax.f32 %v3193_v6, %v3195_v7 }
 0x11c   : > { %v3205_v12 = vpop.f32.mrb[2].mxu0  ;;  %v3207_v13 = vpop.f32.mrb[2].mxu1 }
 0x11d   : > { %v3211_v15 = vpop.f32.mrb[3].mxu0  ;;  %v3213_v16 = vpop.f32.mrb[3].mxu1 }
 0x122   : > { %v3217_v18 = vpop.f32.mrb[4].mxu0  ;;  %v3219_v19 = vpop.f32.mrb[4].mxu1 }
 0x123   : > { %v3223_v21 = vpop.f32.mrb[5].mxu0  ;;  %v3225_v22 = vpop.f32.mrb[5].mxu1 }
 0x124   : > { %v3229_v24 = vpop.f32.mrb[6].mxu0  ;;  %v3231_v25 = vpop.f32.mrb[6].mxu1 }
 0x125   : > { %v3235_v27 = vpop.f32.mrb[7].mxu0  ;;  %v3237_v28 = vpop.f32.mrb[7].mxu1 }
 0x12a   : > { %v3241_v30 = vpop.f32.mrb[8].mxu0  ;;  %v3243_v31 = vpop.f32.mrb[8].mxu1 }
 0x12b   : > { %v3247_v33 = vpop.f32.mrb[9].mxu0  ;;  %v3249_v34 = vpop.f32.mrb[9].mxu1 }
 0x12c   : > { %v3253_v36 = vpop.f32.mrb[10].mxu0  ;;  %v3255_v37 = vpop.f32.mrb[10].mxu1 }
 0x12d   : > { %v3259_v39 = vpop.f32.mrb[11].mxu0  ;;  %v3261_v40 = vpop.f32.mrb[11].mxu1 }
 0x132   : > { %v3265_v42 = vpop.f32.mrb[12].mxu0  ;;  %v3267_v43 = vpop.f32.mrb[12].mxu1 }
 0x133   : > { %v3271_v45 = vpop.f32.mrb[13].mxu0  ;;  %v3273_v46 = vpop.f32.mrb[13].mxu1 }
 0x134   : > { %v3277_v48 = vpop.f32.mrb[14].mxu0  ;;  %v3279_v49 = vpop.f32.mrb[14].mxu1 }
 0x135   : > { %v3283_v51 = vpop.f32.mrb[15].mxu0  ;;  %v3285_v52 = vpop.f32.mrb[15].mxu1 }
 0x13a   : > { %v3289_v54 = vpop.f32.mrb[16].mxu0  ;;  %v3291_v55 = vpop.f32.mrb[16].mxu1 }
 0x13b   : > { %v3295_v57 = vpop.f32.mrb[17].mxu0  ;;  %v3297_v58 = vpop.f32.mrb[17].mxu1 }
 0x13c   : > { %v3301_v60 = vpop.f32.mrb[18].mxu0  ;;  %v3303_v61 = vpop.f32.mrb[18].mxu1 }
 0x13d   : > { %v3307_v63 = vpop.f32.mrb[19].mxu0  ;;  %v3309_v0 = vpop.f32.mrb[19].mxu1 }
 0x142   : > { %v3313_v2 = vpop.f32.mrb[20].mxu0  ;;  %v3315_v3 = vpop.f32.mrb[20].mxu1 }
 0x143   : > { %v3319_v5 = vpop.f32.mrb[21].mxu0  ;;  %v3321_v59 = vpop.f32.mrb[21].mxu1 }
 0x144   : > { %v3325_v56 = vpop.f32.mrb[22].mxu0  ;;  %v3327_v53 = vpop.f32.mrb[22].mxu1 }
 0x145   : > { %v3331_v50 = vpop.f32.mrb[23].mxu0  ;;  %v3333_v47 = vpop.f32.mrb[23].mxu1 }
 0x146   : > { %3588 = vst [vmem:[#allocation3_spill] sm:$0xff] %v3333_v47 }
 0x14a   : > { %v3337_v44 = vpop.f32.mrb[24].mxu0  ;;  %v3339_v41 = vpop.f32.mrb[24].mxu1 }
 0x14b   : > { %3589 = vst [vmem:[#allocation4_spill] sm:$0xff] %v3337_v44  ;;  %3590 = vst [vmem:[#allocation5_spill] sm:$0xff] %v3339_v41  ;;  %v3343_v38 = vpop.f32.mrb[25].mxu0  ;;  %v3345_v35 = vpop.f32.mrb[25].mxu1 }
 0x14c   : > { %3591 = vst [vmem:[#allocation6_spill] sm:$0xff] %v3343_v38  ;;  %3592 = vst [vmem:[#allocation7_spill] sm:$0xff] %v3345_v35  ;;  %v3349_v32 = vpop.f32.mrb[26].mxu0  ;;  %v3351_v29 = vpop.f32.mrb[26].mxu1  ;;  %v3608_v38 = vmax.f32 %v3211_v15, %v3213_v16 }
 0x14d   : > { %3593 = vst [vmem:[#allocation8_spill] sm:$0xff] %v3349_v32  ;;  %3594 = vst [vmem:[#allocation9_spill] sm:$0xff] %v3351_v29  ;;  %v3355_v26 = vpop.f32.mrb[27].mxu0  ;;  %v3357_v23 = vpop.f32.mrb[27].mxu1 }
 0x14e   : > { %3595 = vst [vmem:[#allocation10_spill] sm:$0xff] %v3355_v26  ;;  %3596 = vst [vmem:[#allocation11_spill] sm:$0xff] %v3357_v23 }
 0x152   : > { %v3361_v20 = vpop.f32.mrb[28].mxu0  ;;  %v3363_v17 = vpop.f32.mrb[28].mxu1 }
 0x153   : > { %3597 = vst [vmem:[#allocation12_spill] sm:$0xff] %v3361_v20  ;;  %3598 = vst [vmem:[#allocation13_spill] sm:$0xff] %v3363_v17  ;;  %v3369_v14 = vpop.f32.mrb[29].mxu0  ;;  %v3371_v11 = vpop.f32.mrb[29].mxu1 }
 0x154   : > { %3599 = vst [vmem:[#allocation14_spill] sm:$0xff] %v3369_v14  ;;  %3600 = vst [vmem:[#allocation15_spill] sm:$0xff] %v3371_v11  ;;  %v3375_v8 = vpop.f32.mrb[30].mxu0  ;;  %v3377_v29 = vpop.f32.mrb[30].mxu1 }
 0x155   : > { %3601 = vst [vmem:[#allocation16_spill] sm:$0xff] %v3375_v8  ;;  %3602 = vst [vmem:[#allocation17_spill] sm:$0xff] %v3377_v29  ;;  %v3381_v23 = vpop.f32.mrb[31].mxu0  ;;  %v3383_v26 = vpop.f32.mrb[31].mxu1  ;;  %v3606_v29 = vmax.f32 %v3199_v9, %v3201_v10 }
 0x156   : > { %3603 = vst [vmem:[#allocation18_spill] sm:$0xff] %v3381_v23  ;;  %3604 = vst [vmem:[#allocation19_spill] sm:$0xff] %v3383_v26  ;;  %v3607_v23 = vmax.f32 %v3205_v12, %v3207_v13 }
 0x15a   : > { %v2686_v17 = vpop.f32.mrb[32].mxu0  ;;  %v2722_v20 = vpop.f32.mrb[32].mxu1 }
 0x15b   : > { %v1746_v11 = vmax.f32 %v3605_v4, %v2686_v17  ;;  %v1617_v14 = vpop.f32.mrb[33].mxu0  ;;  %v1971_v32 = vpop.f32.mrb[33].mxu1 }
 0x15c   : > { %v1744_v8 = vmax.f32 %v3606_v29, %v1617_v14  ;;  %v2687_v35 = vpop.f32.mrb[34].mxu0  ;;  %v2723_v1 = vpop.f32.mrb[34].mxu1 }
 0x15d   : > { %v2100_v26 = vmax.f32 %v1746_v11, %v2722_v20  ;;  %v1747_v6 = vmax.f32 %v3607_v23, %v2687_v35  ;;  %v1620_v7 = vpop.f32.mrb[35].mxu0  ;;  %v1974_v17 = vpop.f32.mrb[35].mxu1  ;;  %v3609_v20 = vmax.f32 %v3217_v18, %v3219_v19  ;;  %v3610_v35 = vmax.f32 %v3223_v21, %v3225_v22 }
 0x15e   : > { %v2098_v4 = vmax.f32 %v1744_v8, %v1971_v32  ;;  %v1745_v41 = vmax.f32 %v3608_v38, %v1620_v7 }
 0x15f   : > { %v2139_v44 = vadd.f32 %v3393_v62, %v2100_v26  ;;  %v2101_v47 = vmax.f32 %v1747_v6, %v2723_v1  ;;  %v3611_v1 = vmax.f32 %v3229_v24, %v3231_v25 }
 0x160   : > { %v2137_v9 = vadd.f32 %v3393_v62, %v2098_v4  ;;  %v2099_v10 = vmax.f32 %v1745_v41, %v1974_v17  ;;  %v3612_v17 = vmax.f32 %v3235_v27, %v3237_v28  ;;  %v3613_v28 = vmax.f32 %v3241_v30, %v3243_v31 }
 0x161   : > { %v2171_v11 = vmax.f32 %v2139_v44, 0.0  ;;  %v2140_v8 = vadd.f32 %v3393_v62, %v2101_v47 }
 0x162   : > { %v2169_v12 = vmax.f32 %v2137_v9, 0.0  ;;  %v2138_v13 = vadd.f32 %v3393_v62, %v2099_v10  ;;  %v2690_v14 = vpop.f32.mrb[36].mxu0  ;;  %v2726_v15 = vpop.f32.mrb[36].mxu1 }
 0x163   : > { %2203 = vst [vmem:[%s3408_s14 + $0x10] sm:$0xff] %v2171_v11  ;;  %v2172_v16 = vmax.f32 %v2140_v8, 0.0  ;;  %v1750_v23 = vmax.f32 %v3609_v20, %v2690_v14  ;;  %v1633_v26 = vpop.f32.mrb[37].mxu0  ;;  %v1987_v29 = vpop.f32.mrb[37].mxu1 }
 0x164   : > { %2201 = vst [vmem:[%s3408_s14] sm:$0xff] %v2169_v12  ;;  %v2170_v32 = vmax.f32 %v2138_v13, 0.0  ;;  %v1748_v38 = vmax.f32 %v3610_v35, %v1633_v26  ;;  %v2691_v41 = vpop.f32.mrb[38].mxu0  ;;  %v2727_v44 = vpop.f32.mrb[38].mxu1 }
 0x165   : > { %2204 = vst [vmem:[%s3408_s14 + $0x18] sm:$0xff] %v2172_v16  ;;  %v2104_v47 = vmax.f32 %v1750_v23, %v2726_v15  ;;  %v1751_v6 = vmax.f32 %v3611_v1, %v2691_v41  ;;  %v1636_v7 = vpop.f32.mrb[39].mxu0  ;;  %v1990_v18 = vpop.f32.mrb[39].mxu1  ;;  %v3614_v23 = vmax.f32 %v3247_v33, %v3249_v34 }
 0x166   : > { %2202 = vst [vmem:[%s3408_s14 + $0x8] sm:$0xff] %v2170_v32  ;;  %v2102_v19 = vmax.f32 %v1748_v38, %v1987_v29  ;;  %v1749_v4 = vmax.f32 %v3612_v17, %v1636_v7  ;;  %v3615_v38 = vmax.f32 %v3253_v36, %v3255_v37 }
 0x167   : > { %v2143_v21 = vadd.f32 %v3393_v62, %v2104_v47  ;;  %v2105_v22 = vmax.f32 %v1751_v6, %v2727_v44  ;;  %v3616_v47 = vmax.f32 %v3259_v39, %v3261_v40  ;;  %v3617_v40 = vmax.f32 %v3265_v42, %v3267_v43 }
 0x168   : > { %v2141_v9 = vadd.f32 %v3393_v62, %v2102_v19  ;;  %v2103_v10 = vmax.f32 %v1749_v4, %v1990_v18 }
 0x169   : > { %v2175_v11 = vmax.f32 %v2143_v21, 0.0  ;;  %v2144_v24 = vadd.f32 %v3393_v62, %v2105_v22 }
 0x16a   : > { %v2173_v25 = vmax.f32 %v2141_v9, 0.0  ;;  %v2142_v8 = vadd.f32 %v3393_v62, %v2103_v10  ;;  %v2694_v12 = vpop.f32.mrb[40].mxu0  ;;  %v2730_v13 = vpop.f32.mrb[40].mxu1 }
 0x16b   : > { %2207 = vst [vmem:[%s3408_s14 + $0x30] sm:$0xff] %v2175_v11  ;;  %v2176_v27 = vmax.f32 %v2144_v24, 0.0  ;;  %v1754_v14 = vmax.f32 %v3613_v28, %v2694_v12  ;;  %v1649_v15 = vpop.f32.mrb[41].mxu0  ;;  %v2003_v16 = vpop.f32.mrb[41].mxu1  ;;  %v3618_v11 = vmax.f32 %v3271_v45, %v3273_v46 }
 0x16c   : > { %2205 = vst [vmem:[%s3408_s14 + $0x20] sm:$0xff] %v2173_v25  ;;  %v2174_v20 = vmax.f32 %v2142_v8, 0.0  ;;  %v1752_v26 = vmax.f32 %v3614_v23, %v1649_v15  ;;  %v2695_v29 = vpop.f32.mrb[42].mxu0  ;;  %v2731_v32 = vpop.f32.mrb[42].mxu1 }
 0x16d   : > { %2208 = vst [vmem:[%s3408_s14 + $0x38] sm:$0xff] %v2176_v27  ;;  %v2108_v35 = vmax.f32 %v1754_v14, %v2730_v13  ;;  %v1755_v41 = vmax.f32 %v3615_v38, %v2695_v29  ;;  %v1652_v44 = vpop.f32.mrb[43].mxu0  ;;  %v2006_v30 = vpop.f32.mrb[43].mxu1  ;;  %v3619_v13 = vmax.f32 %v3277_v48, %v3279_v49  ;;  %v3620_v14 = vmax.f32 %v3283_v51, %v3285_v52 }
 0x16e   : > { %2206 = vst [vmem:[%s3408_s14 + $0x28] sm:$0xff] %v2174_v20  ;;  %v2106_v31 = vmax.f32 %v1752_v26, %v2003_v16  ;;  %v1753_v1 = vmax.f32 %v3616_v47, %v1652_v44  ;;  %v3621_v52 = vmax.f32 %v3289_v54, %v3291_v55 }
 0x16f   : > { %v2147_v33 = vadd.f32 %v3393_v62, %v2108_v35  ;;  %v2109_v34 = vmax.f32 %v1755_v41, %v2731_v32 }
 0x170   : > { %v2145_v6 = vadd.f32 %v3393_v62, %v2106_v31  ;;  %v2107_v7 = vmax.f32 %v1753_v1, %v2006_v30  ;;  %v3622_v30 = vmax.f32 %v3295_v57, %v3297_v58 }
 0x171   : > { %v2179_v18 = vmax.f32 %v2147_v33, 0.0  ;;  %v2148_v36 = vadd.f32 %v3393_v62, %v2109_v34  ;;  %v3623_v34 = vmax.f32 %v3301_v60, %v3303_v61 }
 0x172   : > { %v2177_v37 = vmax.f32 %v2145_v6, 0.0  ;;  %v2146_v19 = vadd.f32 %v3393_v62, %v2107_v7  ;;  %v2698_v17 = vpop.f32.mrb[44].mxu0  ;;  %v2734_v4 = vpop.f32.mrb[44].mxu1 }
 0x173   : > { %2211 = vst [vmem:[%s3408_s14 + $0x50] sm:$0xff] %v2179_v18  ;;  %v2180_v39 = vmax.f32 %v2148_v36, 0.0  ;;  %v1758_v21 = vmax.f32 %v3617_v40, %v2698_v17  ;;  %v1665_v22 = vpop.f32.mrb[45].mxu0  ;;  %v2019_v9 = vpop.f32.mrb[45].mxu1  ;;  %v3624_v18 = vmax.f32 %v3307_v63, %v3309_v0  ;;  %v3625_v0 = vmax.f32 %v3313_v2, %v3315_v3 }
 0x174   : > { %2209 = vst [vmem:[%s3408_s14 + $0x40] sm:$0xff] %v2177_v37  ;;  %v2178_v10 = vmax.f32 %v2146_v19, 0.0  ;;  %v1756_v24 = vmax.f32 %v3618_v11, %v1665_v22  ;;  %v2699_v25 = vpop.f32.mrb[46].mxu0  ;;  %v2735_v8 = vpop.f32.mrb[46].mxu1  ;;  %v3626_v11 = vmax.f32 %v3319_v5, %v3321_v59 }
 0x175   : > { %2212 = vst [vmem:[%s3408_s14 + $0x58] sm:$0xff] %v2180_v39  ;;  %v2112_v12 = vmax.f32 %v1758_v21, %v2734_v4  ;;  %v1759_v27 = vmax.f32 %v3619_v13, %v2699_v25  ;;  %v1668_v28 = vpop.f32.mrb[47].mxu0  ;;  %v2022_v42 = vpop.f32.mrb[47].mxu1  ;;  %v3627_v13 = vmax.f32 %v3325_v56, %v3327_v53 }
 0x176   : > { %2210 = vst [vmem:[%s3408_s14 + $0x48] sm:$0xff] %v2178_v10  ;;  %v2110_v43 = vmax.f32 %v1756_v24, %v2019_v9  ;;  %v1757_v15 = vmax.f32 %v3620_v14, %v1668_v28 }
 0x177   : > { %v2151_v45 = vadd.f32 %v3393_v62, %v2112_v12  ;;  %v2113_v46 = vmax.f32 %v1759_v27, %v2735_v8 }
 0x178   : > { %v2149_v16 = vadd.f32 %v3393_v62, %v2110_v43  ;;  %v2111_v20 = vmax.f32 %v1757_v15, %v2022_v42  ;;  %v3628_v42 = vld [vmem:[#allocation3_spill] sm:$0xff] }
 0x179   : > { %v2183_v23 = vmax.f32 %v2151_v45, 0.0  ;;  %v2152_v48 = vadd.f32 %v3393_v62, %v2113_v46  ;;  %v3629_v43 = vmax.f32 %v3331_v50, %v3628_v42 }
 0x17a   : > { %v2181_v49 = vmax.f32 %v2149_v16, 0.0  ;;  %v2150_v26 = vadd.f32 %v3393_v62, %v2111_v20  ;;  %v2702_v29 = vpop.f32.mrb[48].mxu0  ;;  %v2738_v32 = vpop.f32.mrb[48].mxu1 }
 0x17b   : > { %2215 = vst [vmem:[%s3408_s14 + $0x70] sm:$0xff] %v2183_v23  ;;  %v2184_v51 = vmax.f32 %v2152_v48, 0.0  ;;  %v1762_v35 = vmax.f32 %v3621_v52, %v2702_v29  ;;  %v1681_v38 = vpop.f32.mrb[49].mxu0  ;;  %v2035_v41 = vpop.f32.mrb[49].mxu1  ;;  %v3630_v48 = vld [vmem:[#allocation4_spill] sm:$0xff] }
 0x17c   : > { %2213 = vst [vmem:[%s3408_s14 + $0x60] sm:$0xff] %v2181_v49  ;;  %v2182_v44 = vmax.f32 %v2150_v26, 0.0  ;;  %v1760_v31 = vmax.f32 %v3622_v30, %v1681_v38  ;;  %v2703_v47 = vpop.f32.mrb[50].mxu0  ;;  %v2739_v1 = vpop.f32.mrb[50].mxu1  ;;  %v3631_v49 = vld [vmem:[#allocation5_spill] sm:$0xff]  ;;  %v3634_v38 = vld [vmem:[#allocation7_spill] sm:$0xff] }
 0x17d   : > { %2216 = vst [vmem:[%s3408_s14 + $0x78] sm:$0xff] %v2184_v51  ;;  %v2116_v33 = vmax.f32 %v1762_v35, %v2738_v32  ;;  %v1763_v6 = vmax.f32 %v3623_v34, %v2703_v47  ;;  %v1684_v7 = vpop.f32.mrb[51].mxu0  ;;  %v2038_v54 = vpop.f32.mrb[51].mxu1  ;;  %v3632_v26 = vmax.f32 %v3630_v48, %v3631_v49  ;;  %v3633_v35 = vld [vmem:[#allocation6_spill] sm:$0xff] }
 0x17e   : > { %2214 = vst [vmem:[%s3408_s14 + $0x68] sm:$0xff] %v2182_v44  ;;  %v2114_v55 = vmax.f32 %v1760_v31, %v2035_v41  ;;  %v1761_v36 = vmax.f32 %v3624_v18, %v1684_v7  ;;  %v3635_v41 = vmax.f32 %v3633_v35, %v3634_v38  ;;  %v3639_v18 = vld [vmem:[#allocation10_spill] sm:$0xff] }
 0x17f   : > { %v2155_v57 = vadd.f32 %v3393_v62, %v2116_v33  ;;  %v2117_v58 = vmax.f32 %v1763_v6, %v2739_v1  ;;  %v3636_v1 = vld [vmem:[#allocation8_spill] sm:$0xff]  ;;  %v3637_v33 = vld [vmem:[#allocation9_spill] sm:$0xff] }
 0x180   : > { %v2153_v37 = vadd.f32 %v3393_v62, %v2114_v55  ;;  %v2115_v19 = vmax.f32 %v1761_v36, %v2038_v54  ;;  %v3638_v34 = vmax.f32 %v3636_v1, %v3637_v33  ;;  %v3640_v36 = vld [vmem:[#allocation11_spill] sm:$0xff] }
 0x181   : > { %v2187_v17 = vmax.f32 %v2155_v57, 0.0  ;;  %v2156_v60 = vadd.f32 %v3393_v62, %v2117_v58  ;;  %v3641_v57 = vmax.f32 %v3639_v18, %v3640_v36 }
 0x182   : > { %v2185_v61 = vmax.f32 %v2153_v37, 0.0  ;;  %v2154_v4 = vadd.f32 %v3393_v62, %v2115_v19  ;;  %v2706_v39 = vpop.f32.mrb[52].mxu0  ;;  %v2742_v40 = vpop.f32.mrb[52].mxu1 }
 0x183   : > { %2219 = vst [vmem:[%s3408_s14 + $0x90] sm:$0xff] %v2187_v17  ;;  %v2188_v63 = vmax.f32 %v2156_v60, 0.0  ;;  %v1766_v21 = vmax.f32 %v3625_v0, %v2706_v39  ;;  %v1697_v22 = vpop.f32.mrb[53].mxu0  ;;  %v2051_v9 = vpop.f32.mrb[53].mxu1 }
 0x184   : > { %2217 = vst [vmem:[%s3408_s14 + $0x80] sm:$0xff] %v2185_v61  ;;  %v2186_v10 = vmax.f32 %v2154_v4, 0.0  ;;  %v1764_v24 = vmax.f32 %v3626_v11, %v1697_v22  ;;  %v2707_v25 = vpop.f32.mrb[54].mxu0  ;;  %v2743_v8 = vpop.f32.mrb[54].mxu1  ;;  %v3642_v22 = vld [vmem:[#allocation12_spill] sm:$0xff] }
 0x185   : > { %2220 = vst [vmem:[%s3408_s14 + $0x98] sm:$0xff] %v2188_v63  ;;  %v2120_v12 = vmax.f32 %v1766_v21, %v2742_v40  ;;  %v1767_v27 = vmax.f32 %v3627_v13, %v2707_v25  ;;  %v1700_v28 = vpop.f32.mrb[55].mxu0  ;;  %v2054_v2 = vpop.f32.mrb[55].mxu1  ;;  %v3646_v13 = vld [vmem:[#allocation15_spill] sm:$0xff] }
 0x186   : > { %2218 = vst [vmem:[%s3408_s14 + $0x88] sm:$0xff] %v2186_v10  ;;  %v2118_v3 = vmax.f32 %v1764_v24, %v2051_v9  ;;  %v1765_v14 = vmax.f32 %v3629_v43, %v1700_v28  ;;  %v3643_v9 = vld [vmem:[#allocation13_spill] sm:$0xff]  ;;  %v3648_v43 = vld [vmem:[#allocation16_spill] sm:$0xff] }
 0x187   : > { %v2159_v59 = vadd.f32 %v3393_v62, %v2120_v12  ;;  %v2121_v5 = vmax.f32 %v1767_v27, %v2743_v8  ;;  %v3644_v10 = vmax.f32 %v3642_v22, %v3643_v9  ;;  %v3645_v12 = vld [vmem:[#allocation14_spill] sm:$0xff] }
 0x188   : > { %v2157_v15 = vadd.f32 %v3393_v62, %v2118_v3  ;;  %v2119_v45 = vmax.f32 %v1765_v14, %v2054_v2  ;;  %v3647_v27 = vmax.f32 %v3645_v12, %v3646_v13  ;;  %v3649_v14 = vld [vmem:[#allocation17_spill] sm:$0xff] }
 0x189   : > { %v2191_v46 = vmax.f32 %v2159_v59, 0.0  ;;  %v2160_v53 = vadd.f32 %v3393_v62, %v2121_v5  ;;  %v3650_v59 = vmax.f32 %v3648_v43, %v3649_v14 }
 0x18a   : > { %v2189_v56 = vmax.f32 %v2157_v15, 0.0  ;;  %v2158_v16 = vadd.f32 %v3393_v62, %v2119_v45  ;;  %v2710_v20 = vpop.f32.mrb[56].mxu0  ;;  %v2746_v23 = vpop.f32.mrb[56].mxu1 }
 0x18b   : > { %2223 = vst [vmem:[%s3408_s14 + $0xb0] sm:$0xff] %v2191_v46  ;;  %v2192_v50 = vmax.f32 %v2160_v53, 0.0  ;;  %v1770_v29 = vmax.f32 %v3632_v26, %v2710_v20  ;;  %v1713_v32 = vpop.f32.mrb[57].mxu0  ;;  %v2067_v51 = vpop.f32.mrb[57].mxu1  ;;  %v3651_v53 = vld [vmem:[#allocation18_spill] sm:$0xff] }
 0x18c   : > { %2221 = vst [vmem:[%s3408_s14 + $0xa0] sm:$0xff] %v2189_v56  ;;  %v2190_v52 = vmax.f32 %v2158_v16, 0.0  ;;  %v1768_v44 = vmax.f32 %v3635_v41, %v1713_v32  ;;  %v2711_v30 = vpop.f32.mrb[58].mxu0  ;;  %v2747_v31 = vpop.f32.mrb[58].mxu1  ;;  %v3652_v56 = vld [vmem:[#allocation19_spill] sm:$0xff] }
 0x18d   : > { %2224 = vst [vmem:[%s3408_s14 + $0xb8] sm:$0xff] %v2192_v50  ;;  %v2124_v47 = vmax.f32 %v1770_v29, %v2746_v23  ;;  %v1771_v6 = vmax.f32 %v3638_v34, %v2711_v30  ;;  %v1716_v7 = vpop.f32.mrb[59].mxu0  ;;  %v2070_v54 = vpop.f32.mrb[59].mxu1  ;;  %v3653_v16 = vmax.f32 %v3651_v53, %v3652_v56 }
 0x18e   : > { %2222 = vst [vmem:[%s3408_s14 + $0xa8] sm:$0xff] %v2190_v52  ;;  %v2122_v55 = vmax.f32 %v1768_v44, %v2067_v51  ;;  %v1769_v58 = vmax.f32 %v3641_v57, %v1716_v7 }
 0x18f   : > { %v2163_v37 = vadd.f32 %v3393_v62, %v2124_v47  ;;  %v2125_v19 = vmax.f32 %v1771_v6, %v2747_v31 }
 0x190   : > { %v2161_v17 = vadd.f32 %v3393_v62, %v2122_v55  ;;  %v2123_v60 = vmax.f32 %v1769_v58, %v2070_v54 }
 0x191   : > { %v2195_v61 = vmax.f32 %v2163_v37, 0.0  ;;  %v2164_v4 = vadd.f32 %v3393_v62, %v2125_v19 }
 0x192   : > { %v2193_v39 = vmax.f32 %v2161_v17, 0.0  ;;  %v2162_v40 = vadd.f32 %v3393_v62, %v2123_v60  ;;  %v2714_v63 = vpop.f32.mrb[60].mxu0  ;;  %v2750_v0 = vpop.f32.mrb[60].mxu1 }
 0x193   : > { %2227 = vst [vmem:[%s3408_s14 + $0xd0] sm:$0xff] %v2195_v61  ;;  %v2196_v21 = vmax.f32 %v2164_v4, 0.0  ;;  %v1774_v11 = vmax.f32 %v3644_v10, %v2714_v63  ;;  %v1729_v24 = vpop.f32.mrb[61].mxu0  ;;  %v2083_v25 = vpop.f32.mrb[61].mxu1 }
 0x194   : > { %2225 = vst [vmem:[%s3408_s14 + $0xc0] sm:$0xff] %v2193_v39  ;;  %v2194_v8 = vmax.f32 %v2162_v40, 0.0  ;;  %v1772_v28 = vmax.f32 %v3647_v27, %v1729_v24  ;;  %v2715_v2 = vpop.f32.mrb[62].mxu0  ;;  %v2751_v3 = vpop.f32.mrb[62].mxu1 }
 0x195   : > { %2228 = vst [vmem:[%s3408_s14 + $0xd8] sm:$0xff] %v2196_v21  ;;  %v2128_v42 = vmax.f32 %v1774_v11, %v2750_v0  ;;  %v1775_v5 = vmax.f32 %v3650_v59, %v2715_v2  ;;  %v1732_v15 = vpop.f32.mrb[63].mxu0  ;;  %v2086_v45 = vpop.f32.mrb[63].mxu1 }
 0x196   : > { %2226 = vst [vmem:[%s3408_s14 + $0xc8] sm:$0xff] %v2194_v8  ;;  %v2126_v46 = vmax.f32 %v1772_v28, %v2083_v25  ;;  %v1773_v20 = vmax.f32 %v3653_v16, %v1732_v15 }
 0x197   : > { %v2167_v23 = vadd.f32 %v3393_v62, %v2128_v42  ;;  %v2129_v50 = vmax.f32 %v1775_v5, %v2751_v3 }
 0x198   : > { %v2165_v48 = vadd.f32 %v3393_v62, %v2126_v46  ;;  %v2127_v49 = vmax.f32 %v1773_v20, %v2086_v45 }
 0x199   : > { %v2199_v26 = vmax.f32 %v2167_v23, 0.0  ;;  %v2168_v29 = vadd.f32 %v3393_v62, %v2129_v50 }
 0x19a   : > { %v2197_v32 = vmax.f32 %v2165_v48, 0.0  ;;  %v2166_v51 = vadd.f32 %v3393_v62, %v2127_v49 }
 0x19b   : > { %2231 = vst [vmem:[%s3408_s14 + $0xf0] sm:$0xff] %v2199_v26  ;;  %v2200_v52 = vmax.f32 %v2168_v29, 0.0 }
 0x19c   : > { %2229 = vst [vmem:[%s3408_s14 + $0xe0] sm:$0xff] %v2197_v32  ;;  %v2198_v35 = vmax.f32 %v2166_v51, 0.0 }
 0x19d   : > { %2232 = vst [vmem:[%s3408_s14 + $0xf8] sm:$0xff] %v2200_v52 }
 0x19e   : > { %2230 = vst [vmem:[%s3408_s14 + $0xe8] sm:$0xff] %v2198_v35 }
 0x19f PF: > { %p10_p9 = scmp.ge.s32.totalorder %s2905_s16, 4   ;;  %s3654_s12 = smov %s2861_s13 }
 0x1a0   : > { %s3655_s13 = smov %s2914_s19  ;;  %s3656_s14 = smov %s2905_s16 }
 0x1a1   :  { %12 = sbr.rel (!%p10_p9) target bundleno = 2 (0x2), region = 111 }

// kernel: cellface_net.4
= control target key start
LH: loop header
LB: loop body
LE: loop exit
PB: predicated region body
PF: predicated region fallthrough
CT: control target
= control target key end

     0   :  { %s1133_s12 = smov 0   ;;  %s1135_s13 = smov 0   ;;  %s1266_s0 = inlined_call_operand.vmem [shape: bf16[4,112,54], index: 0, kind: input, shape index: {}]   ;;  %s1267_s1 = inlined_call_operand.vmem [shape: bf16[54,128], index: 1, kind: input, shape index: {}]   ;;  %s1268_s2 = inlined_call_operand.vmem [shape: f32[1,128], index: 2, kind: input, shape index: {}]   ;;  %s1269_s3 = inlined_call_operand.vmem [shape: f32[112,128], index: 3, kind: output, shape index: {}]  }
   0x1   :  { %s1137_s14 = smov 0  }
   0x2 LB: > { %s875_s15 = sadd.s32 4294967295, %s1111_s14   ;;  %s1150_s16 = sadd.s32 1, %s1111_s14   ;;  %s1111_s14 = sphi %s1137_s14, %s1272_s14   ;;  %s1107_s13 = sphi %s1135_s13, %s1271_s13   ;;  %s1103_s12 = sphi %s1133_s12, %s1270_s12  }
   0x3   : > { %s17_s17 = ssub.s32 %s1111_s14, %s1150_s16  ;;  %s20_s18 = sadd.s32 1, %s1107_s13 }
   0x4   : > { %p18_p0 = scmp.eq.s32.totalorder %s17_s17, 0  ;;  %p27_p1 = scmp.ne.s32.totalorder %s1107_s13, %s1103_s12 }
   0x5   : > { %p28_p2 = scmp.eq.s32.totalorder %s1111_s14, 0  ;;  %p878_p4 = scmp.ge.s32.totalorder %s1111_s14, 2 }
   0x6   : > { %s1159_s19 = scalar_select %p18_p0, %s1107_s13, %s20_s18  }
   0x7   : > { %p29_p3 = por %p28_p2, %p27_p1  ;;  %127 = sbr.rel (%p878_p4) target bundleno = 27 (0x1b), region = 24 }
   0xe   : > { %130 = sbr.rel (!%p29_p3) target bundleno = 27 (0x1b), region = 28  ;;  %s132_s20 = sand.u32 (%p29_p3), 1, %s1107_s13  }
   0xf   : > { %s942_s21 = smul.u32 (%p29_p3), 28, %s1111_s14 }
  0x10   : > { %s1043_s22 = smul.u32 (%p29_p3), 112, %s132_s20 }
  0x11   : > { %s1167_s25 = scalar_lea.vmem (%p29_p3), %s1266_s0, %s942_s21 }
  0x12   : > { %v153_v0 = vld [vmem:[%s1167_s25] sm:$0xff] (%p29_p3)   ;;  %v157_v1 = vld [vmem:[%s1167_s25 + $0x8] sm:$0xff] (%p29_p3)   ;;  %v161_v2 = vld [vmem:[%s1167_s25 + $0x10] sm:$0xff] (%p29_p3)   ;;  %s134_s26 = scalar_lea.vmem (%p29_p3), [#allocation2], %s1043_s22 }
  0x13   : > { %154 = vst [vmem:[%s134_s26] sm:$0xff] (%p29_p3), %v153_v0   ;;  %158 = vst [vmem:[%s134_s26 + $0x8] sm:$0xff] (%p29_p3), %v157_v1   ;;  %v165_v3 = vld [vmem:[%s1167_s25 + $0x18] sm:$0xf] (%p29_p3)  ;;  %v171_v5 = vld [vmem:[%s1167_s25 + $0x40] sm:$0xff] (%p29_p3)  }
  0x14   : > { %162 = vst [vmem:[%s134_s26 + $0x10] sm:$0xff] (%p29_p3), %v161_v2   ;;  %v167_v4 = vld [vmem:[%s1167_s25 + $0x38] sm:$0xff] (%p29_p3)   ;;  %166 = vst [vmem:[%s134_s26 + $0x18] sm:$0xf] (%p29_p3), %v165_v3  ;;  %v175_v6 = vld [vmem:[%s1167_s25 + $0x48] sm:$0xff] (%p29_p3)  }
  0x15   : > { %168 = vst [vmem:[%s134_s26 + $0x1c] sm:$0xff] %v167_v4   ;;  %172 = vst [vmem:[%s134_s26 + $0x24] sm:$0xff] %v171_v5   ;;  %v179_v7 = vld [vmem:[%s1167_s25 + $0x50] sm:$0xf]  ;;  %v185_v9 = vld [vmem:[%s1167_s25 + $0x78] sm:$0xff]  }
  0x16   : > { %v181_v8 = vld [vmem:[%s1167_s25 + $0x70] sm:$0xff]   ;;  %176 = vst [vmem:[%s134_s26 + $0x2c] sm:$0xff] %v175_v6   ;;  %180 = vst [vmem:[%s134_s26 + $0x34] sm:$0xf] %v179_v7  ;;  %v189_v10 = vld [vmem:[%s1167_s25 + $0x80] sm:$0xff]  }
  0x17   : > { %182 = vst [vmem:[%s134_s26 + $0x38] sm:$0xff] %v181_v8   ;;  %v193_v11 = vld [vmem:[%s1167_s25 + $0x88] sm:$0xf]  ;;  %186 = vst [vmem:[%s134_s26 + $0x40] sm:$0xff] %v185_v9   ;;  %v199_v13 = vld [vmem:[%s1167_s25 + $0xb0] sm:$0xff]  }
  0x18   : > { %190 = vst [vmem:[%s134_s26 + $0x48] sm:$0xff] %v189_v10   ;;  %194 = vst [vmem:[%s134_s26 + $0x50] sm:$0xf] %v193_v11  ;;  %v195_v12 = vld [vmem:[%s1167_s25 + $0xa8] sm:$0xff]   ;;  %v203_v14 = vld [vmem:[%s1167_s25 + $0xb8] sm:$0xff]  }
  0x19   : > { %196 = vst [vmem:[%s134_s26 + $0x54] sm:$0xff] %v195_v12   ;;  %200 = vst [vmem:[%s134_s26 + $0x5c] sm:$0xff] %v199_v13   ;;  %v207_v15 = vld [vmem:[%s1167_s25 + $0xc0] sm:$0xf] }
  0x1a   : > { %204 = vst [vmem:[%s134_s26 + $0x64] sm:$0xff] %v203_v14   ;;  %208 = vst [vmem:[%s134_s26 + $0x6c] sm:$0xf] %v207_v15 }
  0x1b PF: > { %p880_p5 = scmp.ge.s32.totalorder %s1111_s14, 1  ;;  %p286_p6 = scmp.lt.s32.totalorder %s1111_s14, 3 }
  0x1d   : > { %p287_p7 = pnand %p880_p5, %p286_p6 }
  0x1e   : > { %v1069_v16 = vld [vmem:[%s1267_s1] sm:$0xff] (!%p287_p7)   ;;  %v1070_v17 = vld [vmem:[%s1267_s1 + $0x8] sm:$0xff] (!%p287_p7)   ;;  %s293_s4 = sand.u32 (!%p287_p7), 1, %s1103_s12   ;;  %v1071_v18 = vld [vmem:[%s1267_s1 + $0x10] sm:$0xff] (!%p287_p7)   ;;  %vm377_vm0 = vcmask (!%p287_p7), 441344   ;;  %vm390_vm1 = vcmask (!%p287_p7), 1042432  }
  0x1f   : > { %290 = sbr.rel (%p287_p7) target bundleno = 295 (0x127), region = 69  ;;  %975 = vmatprep.subr.bf16.mxu0 (!%p287_p7), %v1069_v16  ;;  %991 = vmatprep.subr.bf16.mxu1 (!%p287_p7), %v1069_v16  ;;  %v1072_v20 = vld [vmem:[%s1267_s1 + $0x18] ss:$0 sps:$4 sm:$0x77] (!%p287_p7)   ;;  %v939_v1 = vld [vmem:[%s1268_s2] ss:$0 sm:$0xff] (!%p287_p7) }
  0x20   : > { %s1044_s5 = smul.u32 (!%p287_p7), 112, %s293_s4  ;;  %976 = vmatpush3.bf16.msra.mxu0 (!%p287_p7), %v1069_v16  ;;  %992 = vmatpush3.bf16.msra.mxu1 (!%p287_p7), %v1069_v16  ;;  %v392_v22 = vsel (!%p287_p7), %vm390_vm1, %v1072_v20, 0 }
  0x21   : > { %977 = vmatprep.subr.bf16.mxu0 (!%p287_p7), %v1070_v17  ;;  %993 = vmatprep.subr.bf16.mxu1 (!%p287_p7), %v1070_v17  ;;  %s317_s11 = smul.u32 (!%p287_p7), 7, %s875_s15 }
  0x22   : > { %s1197_s8 = scalar_lea.vmem (!%p287_p7), [#allocation2], %s1044_s5 }
  0x23   : > { %v1073_v19 = vld [vmem:[%s1197_s8] sm:$0xff] (!%p287_p7)   ;;  %v1075_v23 = vld [vmem:[%s1197_s8 + $0x8] sm:$0xff] (!%p287_p7)   ;;  %v1077_v25 = vld [vmem:[%s1197_s8 + $0x10] sm:$0xff] (!%p287_p7)   ;;  %p318_p8 = scmp.lt.s32.totalorder (!%p287_p7), %s317_s11, 13 }
  0x24   : > { %v1074_v21 = vld [vmem:[%s1197_s8 + $0x1c] sm:$0xff] (!%p287_p7)   ;;  %978 = vmatpush3.bf16.msra.mxu0 (!%p287_p7), %v1070_v17  ;;  %994 = vmatpush3.bf16.msra.mxu1 (!%p287_p7), %v1070_v17  ;;  %v1076_v24 = vld [vmem:[%s1197_s8 + $0x24] sm:$0xff] (!%p287_p7)   ;;  %v1078_v26 = vld [vmem:[%s1197_s8 + $0x2c] sm:$0xff] (!%p287_p7)  }
  0x25   : > { %979 = vmatprep.subr.bf16.mxu0 (!%p287_p7), %v1071_v18  ;;  %995 = vmatprep.subr.bf16.mxu1 (!%p287_p7), %v1071_v18  ;;  %v1079_v27 = vld [vmem:[%s1197_s8 + $0x18] ss:$0 sps:$4 sm:$0xff] (!%p287_p7)   ;;  %v1080_v28 = vld [vmem:[%s1197_s8 + $0x34] ss:$0 sps:$4 sm:$0xff] (!%p287_p7)   ;;  %v1083_v31 = vld [vmem:[%s1197_s8 + $0x40] sm:$0xff] (!%p287_p7)  }
  0x26   : > { %983 = vmatprep.mubr.msk.bf16.mxu0 %vm377_vm0, %v1073_v19  ;;  %999 = vmatprep.mubr.msk.bf16.mxu1 %vm377_vm0, %v1074_v21  ;;  %v1081_v29 = vld [vmem:[%s1197_s8 + $0x38] sm:$0xff]   ;;  %v1085_v33 = vld [vmem:[%s1197_s8 + $0x48] sm:$0xff]   ;;  %v1087_v35 = vld [vmem:[%s1197_s8 + $0x50] ss:$0 sps:$4 sm:$0xff]   ;;  %s1274_s11 = smov (!%p318_p8, %s317_s11), 13 }
  0x27   : > { %v1082_v30 = vld [vmem:[%s1197_s8 + $0x54] sm:$0xff]   ;;  %v1084_v32 = vld [vmem:[%s1197_s8 + $0x5c] sm:$0xff]   ;;  %v1086_v34 = vld [vmem:[%s1197_s8 + $0x64] sm:$0xff]   ;;  %s881_s15 = sshll.u32 %s1274_s11, 3 }
  0x28   : > { %980 = vmatpush3.bf16.msra.mxu0 %v1071_v18  ;;  %996 = vmatpush3.bf16.msra.mxu1 %v1071_v18  ;;  %v1088_v36 = vld [vmem:[%s1197_s8 + $0x6c] ss:$0 sps:$4 sm:$0xff]   ;;  %s1247_s20 = scalar_lea.vmem %s1269_s3, %s881_s15 }
  0x29   : > { %1039 = vmatprep.subr.msk.bf16.mxu0 %vm390_vm1, %v1072_v20  ;;  %1040 = vmatprep.subr.msk.bf16.mxu1 %vm390_vm1, %v1072_v20 }
  0x2c   : > { %982 = vmatpush3.bf16.msra.mxu0 %v392_v22  ;;  %998 = vmatpush3.bf16.msra.mxu1 %v392_v22 }
  0x2d   : > { %1007 = vmatprep.subr.bf16.mxu0 %v1069_v16  ;;  %1023 = vmatprep.subr.bf16.mxu1 %v1069_v16 }
  0x2f   : > { %984 = vmatmul.mubr.msk.bf16.vlgmr.msra.gmra.mrb[0].mxu0 %vm377_vm0, %v1075_v23  ;;  %1000 = vmatmul.mubr.msk.bf16.vlgmr.msra.gmra.mrb[0].mxu1 %vm377_vm0, %v1076_v24 }
  0x30   : > { %1008 = vmatpush3.bf16.msra.mxu0 %v1069_v16  ;;  %1024 = vmatpush3.bf16.msra.mxu1 %v1069_v16 }
  0x31   : > { %1009 = vmatprep.subr.bf16.mxu0 %v1070_v17  ;;  %1025 = vmatprep.subr.bf16.mxu1 %v1070_v17 }
  0x32   : > { %987 = vmatprep.mubr.msk.bf16.mxu0 %vm377_vm0, %v1077_v25  ;;  %1003 = vmatprep.mubr.msk.bf16.mxu1 %vm377_vm0, %v1078_v26 }
  0x34   : > { %1010 = vmatpush3.bf16.msra.mxu0 %v1070_v17  ;;  %1026 = vmatpush3.bf16.msra.mxu1 %v1070_v17 }
  0x35   : > { %1011 = vmatprep.subr.bf16.mxu0 %v1071_v18  ;;  %1027 = vmatprep.subr.bf16.mxu1 %v1071_v18 }
  0x37   : > { %988 = vmatmul.mubr.msk.bf16.gmra.mrb[4].mxu0 %vm377_vm0, %v1079_v27  ;;  %1004 = vmatmul.mubr.msk.bf16.gmra.mrb[4].mxu1 %vm377_vm0, %v1080_v28 }
  0x38   : > { %1012 = vmatpush3.bf16.msra.mxu0 %v1071_v18  ;;  %1028 = vmatpush3.bf16.msra.mxu1 %v1071_v18 }
  0x39   : > { %1041 = vmatprep.subr.msk.bf16.mxu0 %vm390_vm1, %v1072_v20  ;;  %1042 = vmatprep.subr.msk.bf16.mxu1 %vm390_vm1, %v1072_v20 }
  0x3a   : > { %1015 = vmatprep.mubr.msk.bf16.mxu0 %vm377_vm0, %v1081_v29  ;;  %1031 = vmatprep.mubr.msk.bf16.mxu1 %vm377_vm0, %v1082_v30 }
  0x3c   : > { %1014 = vmatpush3.bf16.msra.mxu0 %v392_v22  ;;  %1030 = vmatpush3.bf16.msra.mxu1 %v392_v22 }
  0x3f   : > { %1016 = vmatmul.mubr.msk.bf16.vlgmr.msra.gmra.mrb[8].mxu0 %vm377_vm0, %v1083_v31  ;;  %1032 = vmatmul.mubr.msk.bf16.vlgmr.msra.gmra.mrb[8].mxu1 %vm377_vm0, %v1084_v32 }
  0x40   : > { %1019 = vmatprep.mubr.msk.bf16.mxu0 %vm377_vm0, %v1085_v33  ;;  %1035 = vmatprep.mubr.msk.bf16.mxu1 %vm377_vm0, %v1086_v34 }
  0x47   : > { %1020 = vmatmul.mubr.msk.bf16.gmra.mrb[12].mxu0 %vm377_vm0, %v1087_v35  ;;  %1036 = vmatmul.mubr.msk.bf16.gmra.mrb[12].mxu1 %vm377_vm0, %v1088_v36 }
 0x102   : > { %v985_v37 = vpop.f32.mrb[0].mxu0  ;;  %v1001_v38 = vpop.f32.mrb[0].mxu1 }
 0x103   : > { %v562_v39 = vmax.f32 %v985_v37, %v1001_v38  ;;  %v428_v40 = vpop.f32.mrb[1].mxu0  ;;  %v530_v41 = vpop.f32.mrb[1].mxu1 }
 0x104   : > { %v560_v42 = vmax.f32 %v428_v40, %v530_v41  ;;  %v986_v43 = vpop.f32.mrb[2].mxu0  ;;  %v1002_v44 = vpop.f32.mrb[2].mxu1 }
 0x105   : > { %v563_v45 = vmax.f32 %v986_v43, %v1002_v44  ;;  %v431_v46 = vpop.f32.mrb[3].mxu0  ;;  %v533_v47 = vpop.f32.mrb[3].mxu1 }
 0x106   : > { %v561_v48 = vmax.f32 %v431_v46, %v533_v47 }
 0x10a   : > { %v989_v49 = vpop.f32.mrb[4].mxu0  ;;  %v1005_v50 = vpop.f32.mrb[4].mxu1 }
 0x10b   : > { %v566_v51 = vmax.f32 %v989_v49, %v1005_v50  ;;  %v444_v52 = vpop.f32.mrb[5].mxu0  ;;  %v546_v53 = vpop.f32.mrb[5].mxu1 }
 0x10c   : > { %v564_v54 = vmax.f32 %v444_v52, %v546_v53  ;;  %v990_v55 = vpop.f32.mrb[6].mxu0  ;;  %v1006_v56 = vpop.f32.mrb[6].mxu1 }
 0x10d   : > { %v447_v57 = vpop.f32.mrb[7].mxu0  ;;  %v549_v58 = vpop.f32.mrb[7].mxu1 }
 0x10e   : > { %v565_v59 = vmax.f32 %v447_v57, %v549_v58 }
 0x112   : > { %v1017_v60 = vpop.f32.mrb[8].mxu0  ;;  %v1033_v61 = vpop.f32.mrb[8].mxu1 }
 0x113   : > { %v671_v62 = vmax.f32 %v562_v39, %v1017_v60  ;;  %v639_v63 = vpop.f32.mrb[9].mxu0  ;;  %v748_v0 = vpop.f32.mrb[9].mxu1 }
 0x114   : > { %v669_v2 = vmax.f32 %v560_v42, %v639_v63  ;;  %v1018_v3 = vpop.f32.mrb[10].mxu0  ;;  %v1034_v4 = vpop.f32.mrb[10].mxu1 }
 0x115   : > { %v780_v5 = vmax.f32 %v671_v62, %v1033_v61  ;;  %v672_v6 = vmax.f32 %v563_v45, %v1018_v3  ;;  %v642_v7 = vpop.f32.mrb[11].mxu0  ;;  %v751_v8 = vpop.f32.mrb[11].mxu1 }
 0x116   : > { %v778_v9 = vmax.f32 %v669_v2, %v748_v0  ;;  %v670_v10 = vmax.f32 %v561_v48, %v642_v7 }
 0x117   : > { %v794_v11 = vadd.f32 %v939_v1, %v780_v5  ;;  %v781_v12 = vmax.f32 %v672_v6, %v1034_v4 }
 0x118   : > { %v792_v13 = vadd.f32 %v939_v1, %v778_v9  ;;  %v779_v14 = vmax.f32 %v670_v10, %v751_v8 }
 0x119   : > { %v801_v15 = vmax.f32 %v794_v11, 0.0  ;;  %v795_v16 = vadd.f32 %v939_v1, %v781_v12 }
 0x11a   : > { %v799_v17 = vmax.f32 %v792_v13, 0.0  ;;  %v793_v18 = vadd.f32 %v939_v1, %v779_v14  ;;  %v1021_v19 = vpop.f32.mrb[12].mxu0  ;;  %v1037_v20 = vpop.f32.mrb[12].mxu1 }
 0x11b   : > { %808 = vst [vmem:[%s1247_s20 + $0x10] sm:$0xff] %v801_v15  ;;  %v802_v21 = vmax.f32 %v795_v16, 0.0  ;;  %v675_v22 = vmax.f32 %v566_v51, %v1021_v19  ;;  %v655_v23 = vpop.f32.mrb[13].mxu0  ;;  %v764_v24 = vpop.f32.mrb[13].mxu1 }
 0x11c   : > { %806 = vst [vmem:[%s1247_s20] sm:$0xff] %v799_v17  ;;  %v800_v25 = vmax.f32 %v793_v18, 0.0  ;;  %v673_v26 = vmax.f32 %v564_v54, %v655_v23  ;;  %v1022_v27 = vpop.f32.mrb[14].mxu0  ;;  %v1038_v28 = vpop.f32.mrb[14].mxu1 }
 0x11d   : > { %809 = vst [vmem:[%s1247_s20 + $0x18] sm:$0xff] %v802_v21  ;;  %v784_v29 = vmax.f32 %v675_v22, %v1037_v20  ;;  %v658_v30 = vpop.f32.mrb[15].mxu0  ;;  %v767_v31 = vpop.f32.mrb[15].mxu1 }
 0x11e   : > { %807 = vst [vmem:[%s1247_s20 + $0x8] sm:$0xff] %v800_v25  ;;  %v782_v32 = vmax.f32 %v673_v26, %v764_v24  ;;  %v674_v33 = vmax.f32 %v565_v59, %v658_v30 }
 0x11f   : > { %v798_v34 = vadd.f32 %v939_v1, %v784_v29 }
 0x120   : > { %v796_v35 = vadd.f32 %v939_v1, %v782_v32  ;;  %v783_v36 = vmax.f32 %v674_v33, %v767_v31 }
 0x121   : > { %v805_v37 = vmax.f32 %v798_v34, 0.0 }
 0x122   : > { %v803_v38 = vmax.f32 %v796_v35, 0.0  ;;  %v797_v39 = vadd.f32 %v939_v1, %v783_v36 }
 0x123   : > { %812 = vst [vmem:[%s1247_s20 + $0x30] sm:$0xff] %v805_v37 }
 0x124   : > { %810 = vst [vmem:[%s1247_s20 + $0x20] sm:$0xff] %v803_v38  ;;  %v804_v40 = vmax.f32 %v797_v39, 0.0 }
 0x126   : > { %811 = vst [vmem:[%s1247_s20 + $0x28] sm:$0xff] %v804_v40 }
 0x127 PF: > { %p10_p9 = scmp.ge.s32.totalorder %s1150_s16, 4   ;;  %s1270_s12 = smov %s1107_s13 }
 0x128   : > { %s1271_s13 = smov %s1159_s19  ;;  %s1272_s14 = smov %s1150_s16 }
 0x129   :  { %12 = sbr.rel (!%p10_p9) target bundleno = 2 (0x2), region = 111 }

// kernel: cellface_net.5
= control target key start
LH: loop header
LB: loop body
LE: loop exit
PB: predicated region body
PF: predicated region fallthrough
CT: control target
= control target key end

     0   :  { %v2061_v0 = vmov 0.0   ;;  %vm2062_vm0 = vmmov 0   ;;  %vm94_vm1 = vcmask 1045504   ;;  %vm90_vm2 = vcmask 883712   ;;  %s2652_s1 = inlined_call_operand.vmem [shape: bf16[108,18], index: 1, kind: input, shape index: {}]   ;;  %s2653_s0 = inlined_call_operand.vmem [shape: bf16[16,8,108], index: 0, kind: input, shape index: {}]   ;;  %s2654_s3 = inlined_call_operand.vmem [shape: f32[4,18,120], index: 3, kind: input, shape index: {}]   ;;  %s2655_s2 = inlined_call_operand.vmem [shape: f32[1,18], index: 2, kind: input, shape index: {}]   ;;  %s2656_s5 = inlined_call_operand.vmem [shape: f32[120,84], index: 5, kind: input, shape index: {}]   ;;  %s2657_s7 = inlined_call_operand.vmem [shape: f32[84,5], index: 7, kind: input, shape index: {}]   ;;  %s2658_s4 = inlined_call_operand.vmem [shape: f32[1,120], index: 4, kind: input, shape index: {}]   ;;  %s2659_s6 = inlined_call_operand.vmem [shape: f32[1,84], index: 6, kind: input, shape index: {}]   ;;  %s2660_s8 = inlined_call_operand.vmem [shape: f32[1,5], index: 8, kind: input, shape index: {}]   ;;  %s2661_s9 = inlined_call_operand.vmem [shape: f32[8,5], index: 9, kind: output, shape index: {}]  }
   0x1   :  { %1617 = vmatprep.subr.bf16.mxu0 %v2061_v0  ;;  %1635 = vmatprep.subr.bf16.mxu1 %v2061_v0  ;;  %v2119_v1 = vld [vmem:[%s2652_s1] sm:$0xff]   ;;  %v2130_v2 = vld [vmem:[%s2652_s1 + $0x8] sm:$0xff]   ;;  %v2139_v3 = vld [vmem:[%s2652_s1 + $0x10] sm:$0xff]   ;;  %v2063_v20 = vmov 0.0|0.0   ;;  %vm480_vm3 = vcmask 1041408   ;;  %vm476_vm4 = vcmask 146432  }
   0x2   :  { %1631 = vmatprep.mubr.msk.bf16.mxu0 %vm2062_vm0, %v2061_v0  ;;  %1649 = vmatprep.mubr.msk.bf16.mxu1 %vm2062_vm0, %v2061_v0  ;;  %v2148_v4 = vld [vmem:[%s2652_s1 + $0x18] sm:$0xff]   ;;  %v2157_v5 = vld [vmem:[%s2652_s1 + $0x20] sm:$0xff]   ;;  %v2166_v6 = vld [vmem:[%s2652_s1 + $0x28] sm:$0xff]   ;;  %vm1193_vm5 = vcmask 982016   ;;  %vm1290_vm6 = vcmask 1043456   ;;  %vm1286_vm7 = vcmask 687104  }
   0x3   :  { %1618 = vmatpush3.bf16.msra.mxu0 %v2119_v1  ;;  %1636 = vmatpush3.bf16.msra.mxu1 %v2119_v1  ;;  %v2056_v7 = vld [vmem:[%s2652_s1 + $0x30] sm:$0x3f]   ;;  %v48_v9 = vld [vmem:[%s2653_s0] sm:$0xf]  ;;  %v1398_v13 = vld [vmem:[%s2653_s0 + $0x4] sm:$0xf] }
   0x4   :  { %1619 = vmatprep.subr.bf16.mxu0 %v2061_v0  ;;  %1637 = vmatprep.subr.bf16.mxu1 %v2061_v0  ;;  %v2177_v8 = vsel %vm94_vm1, %v2056_v7, 0  ;;  %v1391_v10 = vld [vmem:[%s2653_s0 + $0x10] sm:$0xf]  ;;  %v1393_v11 = vld [vmem:[%s2653_s0 + $0x20] sm:$0xf]  ;;  %v1406_v17 = vld [vmem:[%s2654_s3 + $0x18] sm:$0xff] }
   0x5   :  { %v1395_v12 = vld [vmem:[%s2653_s0 + $0x30] sm:$0xf]  ;;  %v1400_v14 = vld [vmem:[%s2653_s0 + $0x14] sm:$0xf]  ;;  %v1402_v15 = vld [vmem:[%s2653_s0 + $0x24] sm:$0xf] }
   0x6   :  { %v1404_v16 = vld [vmem:[%s2653_s0 + $0x34] sm:$0xf]  ;;  %v1407_v18 = vld [vmem:[%s2654_s3 + $0x20] sm:$0xff]  ;;  %v1408_v21 = vld [vmem:[%s2654_s3 + $0x28] sm:$0x3]  ;;  %vm1364_vm8 = vcmask 39936  }
   0x7   :  { %1620 = vmatpush3.bf16.msra.mxu0 %v2130_v2  ;;  %1638 = vmatpush3.bf16.msra.mxu1 %v2130_v2  ;;  %v2000_v19 = vpack.c.bf16 %v1407_v18, %v1406_v17  ;;  %v1413_v22 = vld [vmem:[%s2653_s0 + $0x8] sm:$0xf]  ;;  %v284_v62 = vld [vmem:[%s2654_s3] sm:$0xff] }
   0x8   :  { %1621 = vmatprep.subr.bf16.mxu0 %v2061_v0  ;;  %1639 = vmatprep.subr.bf16.mxu1 %v2061_v0  ;;  %v1417_v25 = vld [vmem:[%s2653_s0 + $0x28] sm:$0xf]  ;;  %v2376_v7 = vld [vmem:[%s2655_s2] ss:$0 sm:$0xff] }
   0x9   :  { %v285_v63 = vld [vmem:[%s2654_s3 + $0x8] sm:$0xff] }
   0xb   :  { %1622 = vmatpush3.bf16.msra.mxu0 %v2139_v3  ;;  %1640 = vmatpush3.bf16.msra.mxu1 %v2139_v3 }
   0xc   :  { %1623 = vmatprep.subr.bf16.mxu0 %v2061_v0  ;;  %1641 = vmatprep.subr.bf16.mxu1 %v2061_v0 }
   0xf   :  { %1624 = vmatpush3.bf16.msra.mxu0 %v2148_v4  ;;  %1642 = vmatpush3.bf16.msra.mxu1 %v2148_v4 }
  0x10   :  { %1625 = vmatprep.subr.bf16.mxu0 %v2061_v0  ;;  %1643 = vmatprep.subr.bf16.mxu1 %v2061_v0 }
  0x13   :  { %1626 = vmatpush3.bf16.msra.mxu0 %v2157_v5  ;;  %1644 = vmatpush3.bf16.msra.mxu1 %v2157_v5 }
  0x14   :  { %1627 = vmatprep.subr.bf16.mxu0 %v2061_v0  ;;  %1645 = vmatprep.subr.bf16.mxu1 %v2061_v0 }
  0x17   :  { %1628 = vmatpush3.bf16.msra.mxu0 %v2166_v6  ;;  %1646 = vmatpush3.bf16.msra.mxu1 %v2166_v6 }
  0x18   :  { %1629 = vmatprep.subr.bf16.mxu0 %v2061_v0  ;;  %1647 = vmatprep.subr.bf16.mxu1 %v2061_v0 }
  0x1b   :  { %1630 = vmatpush3.bf16.msra.mxu0 %v2177_v8  ;;  %1648 = vmatpush3.bf16.msra.mxu1 %v2177_v8 }
  0x1c   :  { %1653 = vmatprep.subr.bf16.mxu0 %v2061_v0  ;;  %1671 = vmatprep.subr.bf16.mxu1 %v2061_v0 }
  0x1e   :  { %1632 = vmatmul.mubr.msk.bf16.vlgmr.msra.gmra.mrb[0].mxu0 %vm90_vm2, %v48_v9  ;;  %1650 = vmatmul.mubr.msk.bf16.vlgmr.msra.gmra.mrb[0].mxu1 %vm90_vm2, %v1391_v10  ;;  %v2003_v10 = vpack.c.bf16 %v285_v63, %v284_v62  ;;  %v1175_v63 = vld [vmem:[%s2656_s5 + $0x20] sm:$0xff] }
  0x1f   :  { %1654 = vmatpush3.bf16.msra.mxu0 %v2119_v1  ;;  %1672 = vmatpush3.bf16.msra.mxu1 %v2119_v1 }
  0x20   :  { %1655 = vmatprep.subr.bf16.mxu0 %v2061_v0  ;;  %1673 = vmatprep.subr.bf16.mxu1 %v2061_v0 }
  0x21   :  { %1667 = vmatprep.mubr.msk.bf16.mxu0 %vm2062_vm0, %v2061_v0  ;;  %1685 = vmatprep.mubr.msk.bf16.mxu1 %vm2062_vm0, %v2061_v0 }
  0x23   :  { %1656 = vmatpush3.bf16.msra.mxu0 %v2130_v2  ;;  %1674 = vmatpush3.bf16.msra.mxu1 %v2130_v2 }
  0x24   :  { %1657 = vmatprep.subr.bf16.mxu0 %v2061_v0  ;;  %1675 = vmatprep.subr.bf16.mxu1 %v2061_v0 }
  0x27   :  { %1658 = vmatpush3.bf16.msra.mxu0 %v2139_v3  ;;  %1676 = vmatpush3.bf16.msra.mxu1 %v2139_v3 }
  0x28   :  { %1659 = vmatprep.subr.bf16.mxu0 %v2061_v0  ;;  %1677 = vmatprep.subr.bf16.mxu1 %v2061_v0 }
  0x2b   :  { %1660 = vmatpush3.bf16.msra.mxu0 %v2148_v4  ;;  %1678 = vmatpush3.bf16.msra.mxu1 %v2148_v4 }
  0x2c   :  { %1661 = vmatprep.subr.bf16.mxu0 %v2061_v0  ;;  %1679 = vmatprep.subr.bf16.mxu1 %v2061_v0 }
  0x2f   :  { %1662 = vmatpush3.bf16.msra.mxu0 %v2157_v5  ;;  %1680 = vmatpush3.bf16.msra.mxu1 %v2157_v5 }
  0x30   :  { %1663 = vmatprep.subr.bf16.mxu0 %v2061_v0  ;;  %1681 = vmatprep.subr.bf16.mxu1 %v2061_v0 }
  0x33   :  { %1664 = vmatpush3.bf16.msra.mxu0 %v2166_v6  ;;  %1682 = vmatpush3.bf16.msra.mxu1 %v2166_v6 }
  0x34   :  { %1665 = vmatprep.subr.bf16.mxu0 %v2061_v0  ;;  %1683 = vmatprep.subr.bf16.mxu1 %v2061_v0 }
  0x37   :  { %1666 = vmatpush3.bf16.msra.mxu0 %v2177_v8  ;;  %1684 = vmatpush3.bf16.msra.mxu1 %v2177_v8 }
  0x38   :  { %1689 = vmatprep.subr.bf16.mxu0 %v2061_v0  ;;  %1707 = vmatprep.subr.bf16.mxu1 %v2061_v0 }
  0x3a   :  { %1668 = vmatmul.mubr.msk.bf16.vlgmr.msra.gmra.mrb[4].mxu0 %vm90_vm2, %v1393_v11  ;;  %1686 = vmatmul.mubr.msk.bf16.vlgmr.msra.gmra.mrb[4].mxu1 %vm90_vm2, %v1395_v12 }
  0x3b   :  { %1690 = vmatpush3.bf16.msra.mxu0 %v2119_v1  ;;  %1708 = vmatpush3.bf16.msra.mxu1 %v2119_v1 }
  0x3c   :  { %1691 = vmatprep.subr.bf16.mxu0 %v2061_v0  ;;  %1709 = vmatprep.subr.bf16.mxu1 %v2061_v0 }
  0x3d   :  { %1703 = vmatprep.mubr.msk.bf16.mxu0 %vm2062_vm0, %v2061_v0  ;;  %1721 = vmatprep.mubr.msk.bf16.mxu1 %vm2062_vm0, %v2061_v0 }
  0x3f   :  { %1692 = vmatpush3.bf16.msra.mxu0 %v2130_v2  ;;  %1710 = vmatpush3.bf16.msra.mxu1 %v2130_v2 }
  0x40   :  { %1693 = vmatprep.subr.bf16.mxu0 %v2061_v0  ;;  %1711 = vmatprep.subr.bf16.mxu1 %v2061_v0 }
  0x43   :  { %1694 = vmatpush3.bf16.msra.mxu0 %v2139_v3  ;;  %1712 = vmatpush3.bf16.msra.mxu1 %v2139_v3 }
  0x44   :  { %1695 = vmatprep.subr.bf16.mxu0 %v2061_v0  ;;  %1713 = vmatprep.subr.bf16.mxu1 %v2061_v0 }
  0x47   :  { %1696 = vmatpush3.bf16.msra.mxu0 %v2148_v4  ;;  %1714 = vmatpush3.bf16.msra.mxu1 %v2148_v4 }
  0x48   :  { %1697 = vmatprep.subr.bf16.mxu0 %v2061_v0  ;;  %1715 = vmatprep.subr.bf16.mxu1 %v2061_v0 }
  0x4b   :  { %1698 = vmatpush3.bf16.msra.mxu0 %v2157_v5  ;;  %1716 = vmatpush3.bf16.msra.mxu1 %v2157_v5 }
  0x4c   :  { %1699 = vmatprep.subr.bf16.mxu0 %v2061_v0  ;;  %1717 = vmatprep.subr.bf16.mxu1 %v2061_v0 }
  0x4f   :  { %1700 = vmatpush3.bf16.msra.mxu0 %v2166_v6  ;;  %1718 = vmatpush3.bf16.msra.mxu1 %v2166_v6 }
  0x50   :  { %1701 = vmatprep.subr.bf16.mxu0 %v2061_v0  ;;  %1719 = vmatprep.subr.bf16.mxu1 %v2061_v0 }
  0x53   :  { %1702 = vmatpush3.bf16.msra.mxu0 %v2177_v8  ;;  %1720 = vmatpush3.bf16.msra.mxu1 %v2177_v8 }
  0x54   :  { %1725 = vmatprep.subr.bf16.mxu0 %v2061_v0  ;;  %1743 = vmatprep.subr.bf16.mxu1 %v2061_v0 }
  0x56   :  { %1704 = vmatmul.mubr.msk.bf16.vlgmr.msra.gmra.mrb[8].mxu0 %vm90_vm2, %v1398_v13  ;;  %1722 = vmatmul.mubr.msk.bf16.vlgmr.msra.gmra.mrb[8].mxu1 %vm90_vm2, %v1400_v14  ;;  %v286_v13 = vld [vmem:[%s2654_s3 + $0x10] sm:$0x3] }
  0x57   :  { %1726 = vmatpush3.bf16.msra.mxu0 %v2119_v1  ;;  %1744 = vmatpush3.bf16.msra.mxu1 %v2119_v1 }
  0x58   :  { %1727 = vmatprep.subr.bf16.mxu0 %v2061_v0  ;;  %1745 = vmatprep.subr.bf16.mxu1 %v2061_v0 }
  0x59   :  { %1739 = vmatprep.mubr.msk.bf16.mxu0 %vm2062_vm0, %v2061_v0  ;;  %1757 = vmatprep.mubr.msk.bf16.mxu1 %vm2062_vm0, %v2061_v0 }
  0x5b   :  { %1728 = vmatpush3.bf16.msra.mxu0 %v2130_v2  ;;  %1746 = vmatpush3.bf16.msra.mxu1 %v2130_v2 }
  0x5c   :  { %1729 = vmatprep.subr.bf16.mxu0 %v2061_v0  ;;  %1747 = vmatprep.subr.bf16.mxu1 %v2061_v0 }
  0x5f   :  { %1730 = vmatpush3.bf16.msra.mxu0 %v2139_v3  ;;  %1748 = vmatpush3.bf16.msra.mxu1 %v2139_v3 }
  0x60   :  { %1731 = vmatprep.subr.bf16.mxu0 %v2061_v0  ;;  %1749 = vmatprep.subr.bf16.mxu1 %v2061_v0 }
  0x63   :  { %1732 = vmatpush3.bf16.msra.mxu0 %v2148_v4  ;;  %1750 = vmatpush3.bf16.msra.mxu1 %v2148_v4 }
  0x64   :  { %1733 = vmatprep.subr.bf16.mxu0 %v2061_v0  ;;  %1751 = vmatprep.subr.bf16.mxu1 %v2061_v0 }
  0x67   :  { %1734 = vmatpush3.bf16.msra.mxu0 %v2157_v5  ;;  %1752 = vmatpush3.bf16.msra.mxu1 %v2157_v5 }
  0x68   :  { %1735 = vmatprep.subr.bf16.mxu0 %v2061_v0  ;;  %1753 = vmatprep.subr.bf16.mxu1 %v2061_v0 }
  0x6b   :  { %1736 = vmatpush3.bf16.msra.mxu0 %v2166_v6  ;;  %1754 = vmatpush3.bf16.msra.mxu1 %v2166_v6 }
  0x6c   :  { %1737 = vmatprep.subr.bf16.mxu0 %v2061_v0  ;;  %1755 = vmatprep.subr.bf16.mxu1 %v2061_v0 }
  0x6f   :  { %1738 = vmatpush3.bf16.msra.mxu0 %v2177_v8  ;;  %1756 = vmatpush3.bf16.msra.mxu1 %v2177_v8 }
  0x70   :  { %1779 = vmatprep.subr.bf16.mxu0 %v2061_v0  ;;  %1999 = vmatprep.subr.bf16.mxu1 %v2063_v20 }
  0x72   :  { %1740 = vmatmul.mubr.msk.bf16.vlgmr.msra.gmra.mrb[12].mxu0 %vm90_vm2, %v1402_v15  ;;  %1758 = vmatmul.mubr.msk.bf16.vlgmr.msra.gmra.mrb[12].mxu1 %vm90_vm2, %v1404_v16  ;;  %v1415_v15 = vld [vmem:[%s2653_s0 + $0x18] sm:$0xf] }
  0x73   :  { %1780 = vmatpush3.bf16.msra.mxu0 %v2119_v1  ;;  %1767 = vmatprep.mubr.msk.f32.mxu1 %vm2062_vm0, %v2061_v0  ;;  %v1419_v16 = vld [vmem:[%s2653_s0 + $0x38] sm:$0xf] }
  0x74   :  { %1781 = vmatprep.subr.bf16.mxu0 %v2061_v0  ;;  %1793 = vmatprep.mubr.msk.bf16.mxu0 %vm2062_vm0, %v2061_v0 }
  0x75   :  { %2001 = vmatpush3.bf16.msra.mxu1 %v2000_v19 }
  0x76   :  { %1765 = vmatprep.subr.mxu1 %v2061_v0 }
  0x77   :  { %1782 = vmatpush3.bf16.msra.mxu0 %v2130_v2 }
  0x78   :  { %1783 = vmatprep.subr.bf16.mxu0 %v2061_v0 }
  0x79   :  { %1766 = vmatpush3.msk.msra.mxu1 %vm480_vm3, %v1408_v21 }
  0x7a   :  { %2002 = vmatprep.subr.bf16.mxu1 %v2063_v20 }
  0x7b   :  { %1784 = vmatpush3.bf16.msra.mxu0 %v2139_v3 }
  0x7c   :  { %1785 = vmatprep.subr.bf16.mxu0 %v2061_v0 }
  0x7f   :  { %1786 = vmatpush3.bf16.msra.mxu0 %v2148_v4 }
  0x80   :  { %1787 = vmatprep.subr.bf16.mxu0 %v2061_v0 }
  0x83   :  { %1788 = vmatpush3.bf16.msra.mxu0 %v2157_v5 }
  0x84   :  { %1789 = vmatprep.subr.bf16.mxu0 %v2061_v0 }
  0x87   :  { %1790 = vmatpush3.bf16.msra.mxu0 %v2166_v6 }
  0x88   :  { %1791 = vmatprep.subr.bf16.mxu0 %v2061_v0 }
  0x8b   :  { %1792 = vmatpush3.bf16.msra.mxu0 %v2177_v8 }
  0x8c   :  { %1815 = vmatprep.subr.bf16.mxu0 %v2061_v0 }
  0x8e   :  { %1794 = vmatmul.mubr.msk.bf16.vlgmr.msra.gmra.mrb[16].mxu0 %vm90_vm2, %v1413_v22 }
  0x8f   :  { %1816 = vmatpush3.bf16.msra.mxu0 %v2119_v1  ;;  %1829 = vmatprep.mubr.msk.bf16.mxu0 %vm2062_vm0, %v2061_v0 }
  0x90   :  { %1817 = vmatprep.subr.bf16.mxu0 %v2061_v0 }
  0x93   :  { %1818 = vmatpush3.bf16.msra.mxu0 %v2130_v2 }
  0x94   :  { %1819 = vmatprep.subr.bf16.mxu0 %v2061_v0 }
  0x97   :  { %1820 = vmatpush3.bf16.msra.mxu0 %v2139_v3 }
  0x98   :  { %1821 = vmatprep.subr.bf16.mxu0 %v2061_v0 }
  0x9b   :  { %1822 = vmatpush3.bf16.msra.mxu0 %v2148_v4 }
  0x9c   :  { %1823 = vmatprep.subr.bf16.mxu0 %v2061_v0 }
  0x9f   :  { %1824 = vmatpush3.bf16.msra.mxu0 %v2157_v5 }
  0xa0   :  { %1825 = vmatprep.subr.bf16.mxu0 %v2061_v0 }
  0xa3   :  { %1826 = vmatpush3.bf16.msra.mxu0 %v2166_v6 }
  0xa4   :  { %1827 = vmatprep.subr.bf16.mxu0 %v2061_v0 }
  0xa7   :  { %1828 = vmatpush3.bf16.msra.mxu0 %v2177_v8 }
  0xa8   :  { %2005 = vmatprep.subr.bf16.mxu0 %v2063_v20 }
  0xaa   :  { %1830 = vmatmul.mubr.msk.bf16.vlgmr.msra.gmra.mrb[20].mxu0 %vm90_vm2, %v1417_v25  ;;  %v1422_v25 = vld [vmem:[%s2654_s3 + $0x38] sm:$0xff] }
  0xab   :  { %1857 = vmatprep.mubr.msk.f32.mxu0 %vm2062_vm0, %v2061_v0 }
  0xf1   :  { %v132_v23 = vpop.f32.mrb[0].mxu0  ;;  %v177_v24 = vpop.f32.mrb[0].mxu1 }
  0xf2   :  { %v183_v26 = vmax.f32 %v132_v23, %v177_v24  ;;  %v1633_v27 = vpop.f32.mrb[1].mxu0  ;;  %v1651_v28 = vpop.f32.mrb[1].mxu1  ;;  %v1421_v24 = vld [vmem:[%s2654_s3 + $0x30] sm:$0xff] }
  0xf3   :  { %v135_v29 = vpop.f32.mrb[2].mxu0  ;;  %v180_v30 = vpop.f32.mrb[2].mxu1  ;;  %v2006_v27 = vpack.c.bf16 %v1422_v25, %v1421_v24 }
  0xf4   :  { %v1634_v31 = vpop.f32.mrb[3].mxu0  ;;  %v1652_v32 = vpop.f32.mrb[3].mxu1  ;;  %v1423_v29 = vld [vmem:[%s2654_s3 + $0x40] sm:$0x3]  ;;  %v1426_v30 = vld [vmem:[%s2653_s0 + $0xc] sm:$0xf] }
  0xf5   :  { %2007 = vmatpush3.bf16.msra.mxu0 %v2006_v27  ;;  %v1430_v31 = vld [vmem:[%s2653_s0 + $0x2c] sm:$0xf] }
  0xf6   :  { %1855 = vmatprep.subr.mxu0 %v2061_v0 }
  0xf9   :  { %1856 = vmatpush3.msk.msra.mxu0 %vm480_vm3, %v1423_v29 }
  0xfa   :  { %1878 = vmatprep.subr.bf16.mxu0 %v2061_v0 }
 0x10d   :  { %v223_v33 = vpop.f32.mrb[4].mxu0  ;;  %v269_v34 = vpop.f32.mrb[4].mxu1 }
 0x10e   :  { %v229_v35 = vmax.f32 %v183_v26, %v223_v33  ;;  %v1669_v36 = vpop.f32.mrb[5].mxu0  ;;  %v1687_v37 = vpop.f32.mrb[5].mxu1 }
 0x10f   :  { %v226_v38 = vpop.f32.mrb[6].mxu0  ;;  %v272_v39 = vpop.f32.mrb[6].mxu1 }
 0x110   :  { %v275_v40 = vmax.f32 %v229_v35, %v269_v34  ;;  %v1670_v41 = vpop.f32.mrb[7].mxu0  ;;  %v1688_v42 = vpop.f32.mrb[7].mxu1 }
 0x112   :  { %v282_v12 = vadd.f32 %v2376_v7, %v275_v40 }
 0x114   :  { %v283_v14 = vmax.f32 %v282_v12, 0.0  ;;  %v1178_v12 = vld [vmem:[%s2656_s5 + $0x38] sm:$0xff] }
 0x129   :  { %v326_v43 = vpop.f32.mrb[8].mxu0  ;;  %v371_v44 = vpop.f32.mrb[8].mxu1 }
 0x12a   :  { %v377_v45 = vmax.f32 %v326_v43, %v371_v44  ;;  %v1705_v46 = vpop.f32.mrb[9].mxu0  ;;  %v1723_v47 = vpop.f32.mrb[9].mxu1 }
 0x12b   :  { %v329_v48 = vpop.f32.mrb[10].mxu0  ;;  %v374_v49 = vpop.f32.mrb[10].mxu1 }
 0x12c   :  { %v1706_v50 = vpop.f32.mrb[11].mxu0  ;;  %v1724_v51 = vpop.f32.mrb[11].mxu1 }
 0x12d   :  { %v1428_v50 = vld [vmem:[%s2653_s0 + $0x1c] sm:$0xf] }
 0x145   :  { %v417_v52 = vpop.f32.mrb[12].mxu0  ;;  %v463_v53 = vpop.f32.mrb[12].mxu1 }
 0x146   :  { %v423_v54 = vmax.f32 %v377_v45, %v417_v52  ;;  %v1741_v55 = vpop.f32.mrb[13].mxu0  ;;  %v1759_v56 = vpop.f32.mrb[13].mxu1  ;;  %v1435_v52 = vld [vmem:[%s2654_s3 + $0x50] sm:$0xff] }
 0x147   :  { %v420_v57 = vpop.f32.mrb[14].mxu0  ;;  %v466_v58 = vpop.f32.mrb[14].mxu1  ;;  %v1436_v56 = vld [vmem:[%s2654_s3 + $0x58] sm:$0x3] }
 0x148   :  { %v469_v59 = vmax.f32 %v423_v54, %v463_v53  ;;  %v1742_v60 = vpop.f32.mrb[15].mxu0  ;;  %v1760_v61 = vpop.f32.mrb[15].mxu1  ;;  %v1171_v57 = vld [vmem:[%s2656_s5] sm:$0xff]  ;;  %v1172_v58 = vld [vmem:[%s2656_s5 + $0x8] sm:$0xff] }
 0x149   :  { %v2012_v60 = vpack.c.bf16 %v1172_v58, %v1171_v57  ;;  %v1174_v61 = vld [vmem:[%s2656_s5 + $0x18] sm:$0xff] }
 0x14a   :  { %v470_v9 = vadd.f32 %v2376_v7, %v469_v59  ;;  %v1173_v59 = vld [vmem:[%s2656_s5 + $0x10] sm:$0xff] }
 0x14b   :  { %v2015_v62 = vpack.c.bf16 %v1174_v61, %v1173_v59 }
 0x14c   :  { %v471_v11 = vmax.f32 %v470_v9, 0.0  ;;  %v1176_v9 = vld [vmem:[%s2656_s5 + $0x28] sm:$0xff] }
 0x14e   :  { %1768 = vmatmul.mubr.msk.f32.vlgmr.msra.gmra.mrb[16].mxu1 %vm476_vm4, %v471_v11  ;;  %v1177_v11 = vld [vmem:[%s2656_s5 + $0x30] sm:$0xff] }
 0x14f   :  { %2004 = vmatpush3.bf16.msra.mxu1 %v2003_v10  ;;  %1776 = vmatprep.mubr.msk.f32.mxu1 %vm2062_vm0, %v2061_v0  ;;  %v2018_v10 = vpack.c.bf16 %v1176_v9, %v1175_v63 }
 0x150   :  { %1774 = vmatprep.subr.mxu1 %v2061_v0 }
 0x153   :  { %1775 = vmatpush3.msk.msra.mxu1 %vm480_vm3, %v286_v13  ;;  %v2021_v13 = vpack.c.bf16 %v1178_v12, %v1177_v11 }
 0x154   :  { %1777 = vmatmul.mubr.msk.f32.vlgmr.msra.gmra.mrb[18].mxu1 %vm476_vm4, %v283_v14  ;;  %1797 = vmatprep.subr.bf16.mxu1 %v2061_v0  ;;  %v1179_v14 = vld [vmem:[%s2656_s5 + $0x40] sm:$0xff] }
 0x155   :  { %1798 = vmatpush3.bf16.msra.mxu1 %v2119_v1  ;;  %1811 = vmatprep.mubr.msk.bf16.mxu1 %vm2062_vm0, %v2061_v0 }
 0x156   :  { %1799 = vmatprep.subr.bf16.mxu1 %v2061_v0 }
 0x159   :  { %1800 = vmatpush3.bf16.msra.mxu1 %v2130_v2 }
 0x15a   :  { %1801 = vmatprep.subr.bf16.mxu1 %v2061_v0 }
 0x15d   :  { %1802 = vmatpush3.bf16.msra.mxu1 %v2139_v3 }
 0x15e   :  { %1803 = vmatprep.subr.bf16.mxu1 %v2061_v0 }
 0x161   :  { %1804 = vmatpush3.bf16.msra.mxu1 %v2148_v4  ;;  %v669_v17 = vpop.f32.mrb[16].mxu0 }
 0x162   :  { %1805 = vmatprep.subr.bf16.mxu1 %v2061_v0  ;;  %v1795_v18 = vpop.f32.mrb[17].mxu0 }
 0x163   :  { %v672_v19 = vpop.f32.mrb[18].mxu0  ;;  %v1182_v18 = vld [vmem:[%s2656_s5 + $0x58] sm:$0xff] }
 0x164   :  { %v1796_v21 = vpop.f32.mrb[19].mxu0 }
 0x165   :  { %1806 = vmatpush3.bf16.msra.mxu1 %v2157_v5 }
 0x166   :  { %1807 = vmatprep.subr.bf16.mxu1 %v2061_v0 }
 0x169   :  { %1808 = vmatpush3.bf16.msra.mxu1 %v2166_v6 }
 0x16a   :  { %1809 = vmatprep.subr.bf16.mxu1 %v2061_v0 }
 0x16d   :  { %1810 = vmatpush3.bf16.msra.mxu1 %v2177_v8 }
 0x16e   :  { %1833 = vmatprep.subr.bf16.mxu1 %v2061_v0 }
 0x170   :  { %1812 = vmatmul.mubr.msk.bf16.vlgmr.msra.gmra.mrb[20].mxu1 %vm90_vm2, %v1415_v15  ;;  %v1180_v15 = vld [vmem:[%s2656_s5 + $0x48] sm:$0xff] }
 0x171   :  { %1834 = vmatpush3.bf16.msra.mxu1 %v2119_v1  ;;  %1847 = vmatprep.mubr.msk.bf16.mxu1 %vm2062_vm0, %v2061_v0 }
 0x172   :  { %1835 = vmatprep.subr.bf16.mxu1 %v2061_v0 }
 0x175   :  { %1836 = vmatpush3.bf16.msra.mxu1 %v2130_v2 }
 0x176   :  { %1837 = vmatprep.subr.bf16.mxu1 %v2061_v0 }
 0x179   :  { %1838 = vmatpush3.bf16.msra.mxu1 %v2139_v3 }
 0x17a   :  { %1839 = vmatprep.subr.bf16.mxu1 %v2061_v0 }
 0x17d   :  { %1840 = vmatpush3.bf16.msra.mxu1 %v2148_v4  ;;  %v760_v22 = vpop.f32.mrb[20].mxu0 }
 0x17e   :  { %1841 = vmatprep.subr.bf16.mxu1 %v2061_v0  ;;  %v1831_v23 = vpop.f32.mrb[21].mxu0 }
 0x17f   :  { %v763_v26 = vpop.f32.mrb[22].mxu0 }
 0x180   :  { %v1832_v28 = vpop.f32.mrb[23].mxu0 }
 0x181   :  { %1842 = vmatpush3.bf16.msra.mxu1 %v2157_v5 }
 0x182   :  { %1843 = vmatprep.subr.bf16.mxu1 %v2061_v0 }
 0x185   :  { %1844 = vmatpush3.bf16.msra.mxu1 %v2166_v6 }
 0x186   :  { %1845 = vmatprep.subr.bf16.mxu1 %v2061_v0 }
 0x189   :  { %1846 = vmatpush3.bf16.msra.mxu1 %v2177_v8 }
 0x18a   :  { %1860 = vmatprep.subr.bf16.mxu1 %v2061_v0 }
 0x18c   :  { %1848 = vmatmul.mubr.msk.bf16.vlgmr.msra.gmra.mrb[24].mxu1 %vm90_vm2, %v1419_v16  ;;  %v2024_v16 = vpack.c.bf16 %v1180_v15, %v1179_v14 }
 0x18d   :  { %1861 = vmatpush3.bf16.msra.mxu1 %v2119_v1  ;;  %1874 = vmatprep.mubr.msk.bf16.mxu1 %vm2062_vm0, %v2061_v0 }
 0x18e   :  { %1862 = vmatprep.subr.bf16.mxu1 %v2061_v0 }
 0x191   :  { %1863 = vmatpush3.bf16.msra.mxu1 %v2130_v2 }
 0x192   :  { %1864 = vmatprep.subr.bf16.mxu1 %v2061_v0 }
 0x195   :  { %1865 = vmatpush3.bf16.msra.mxu1 %v2139_v3 }
 0x196   :  { %1866 = vmatprep.subr.bf16.mxu1 %v2061_v0 }
 0x199   :  { %1867 = vmatpush3.bf16.msra.mxu1 %v2148_v4 }
 0x19a   :  { %1868 = vmatprep.subr.bf16.mxu1 %v2061_v0 }
 0x19d   :  { %1869 = vmatpush3.bf16.msra.mxu1 %v2157_v5 }
 0x19e   :  { %1870 = vmatprep.subr.bf16.mxu1 %v2061_v0 }
 0x1a1   :  { %1871 = vmatpush3.bf16.msra.mxu1 %v2166_v6 }
 0x1a2   :  { %1872 = vmatprep.subr.bf16.mxu1 %v2061_v0 }
 0x1a5   :  { %1873 = vmatpush3.bf16.msra.mxu1 %v2177_v8 }
 0x1a6   :  { %1896 = vmatprep.subr.bf16.mxu1 %v2061_v0 }
 0x1a8   :  { %1875 = vmatmul.mubr.msk.bf16.vlgmr.msra.gmra.mrb[28].mxu1 %vm90_vm2, %v1426_v30 }
 0x1a9   :  { %1897 = vmatpush3.bf16.msra.mxu1 %v2119_v1  ;;  %1910 = vmatprep.mubr.msk.bf16.mxu1 %vm2062_vm0, %v2061_v0 }
 0x1aa   :  { %1898 = vmatprep.subr.bf16.mxu1 %v2061_v0 }
 0x1ad   :  { %1899 = vmatpush3.bf16.msra.mxu1 %v2130_v2 }
 0x1ae   :  { %1900 = vmatprep.subr.bf16.mxu1 %v2061_v0 }
 0x1b1   :  { %1901 = vmatpush3.bf16.msra.mxu1 %v2139_v3 }
 0x1b2   :  { %1902 = vmatprep.subr.bf16.mxu1 %v2061_v0 }
 0x1b5   :  { %1903 = vmatpush3.bf16.msra.mxu1 %v2148_v4 }
 0x1b6   :  { %1904 = vmatprep.subr.bf16.mxu1 %v2061_v0 }
 0x1b9   :  { %1905 = vmatpush3.bf16.msra.mxu1 %v2157_v5 }
 0x1ba   :  { %1906 = vmatprep.subr.bf16.mxu1 %v2061_v0 }
 0x1bd   :  { %1907 = vmatpush3.bf16.msra.mxu1 %v2166_v6 }
 0x1be   :  { %1908 = vmatprep.subr.bf16.mxu1 %v2061_v0 }
 0x1c1   :  { %1909 = vmatpush3.bf16.msra.mxu1 %v2177_v8 }
 0x1c2   :  { %2008 = vmatprep.subr.bf16.mxu1 %v2063_v20 }
 0x1c4   :  { %1911 = vmatmul.mubr.msk.bf16.vlgmr.msra.gmra.mrb[32].mxu1 %vm90_vm2, %v1430_v31 }
 0x1c5   :  { %1938 = vmatprep.mubr.msk.f32.mxu1 %vm2062_vm0, %v2061_v0 }
 0x221   :  { %v550_v32 = vpop.f32.mrb[16].mxu1 }
 0x222   :  { %v1769_v33 = vpop.f32.mrb[17].mxu1 }
 0x227   :  { %v626_v34 = vpop.f32.mrb[18].mxu1 }
 0x228   :  { %v2484_v35 = vadd.f32 %v626_v34, %v550_v32  ;;  %v1778_v36 = vpop.f32.mrb[19].mxu1 }
 0x243   :  { %v714_v37 = vpop.f32.mrb[20].mxu1 }
 0x244   :  { %v720_v38 = vmax.f32 %v669_v17, %v714_v37  ;;  %v1813_v39 = vpop.f32.mrb[21].mxu1  ;;  %v1181_v17 = vld [vmem:[%s2656_s5 + $0x50] sm:$0xff] }
 0x245   :  { %v717_v40 = vpop.f32.mrb[22].mxu1  ;;  %v2027_v19 = vpack.c.bf16 %v1182_v18, %v1181_v17 }
 0x246   :  { %v766_v41 = vmax.f32 %v720_v38, %v760_v22  ;;  %v1814_v42 = vpop.f32.mrb[23].mxu1  ;;  %v1184_v38 = vld [vmem:[%s2656_s5 + $0x68] sm:$0xff]  ;;  %v1268_v40 = vld [vmem:[%s2657_s7] sm:$0xff] }
 0x247   :  { %v1270_v42 = vld [vmem:[%s2657_s7 + $0x10] sm:$0xff] }
 0x25f   :  { %v806_v43 = vpop.f32.mrb[24].mxu1 }
 0x260   :  { %v812_v44 = vmax.f32 %v766_v41, %v806_v43  ;;  %v1849_v45 = vpop.f32.mrb[25].mxu1  ;;  %v1269_v41 = vld [vmem:[%s2657_s7 + $0x8] sm:$0xff] }
 0x261   :  { %v809_v46 = vpop.f32.mrb[26].mxu1  ;;  %v2033_v43 = vpack.c.bf16 %v1269_v41, %v1268_v40 }
 0x262   :  { %v813_v47 = vadd.f32 %v2376_v7, %v812_v44  ;;  %v1850_v48 = vpop.f32.mrb[27].mxu1  ;;  %v1271_v44 = vld [vmem:[%s2657_s7 + $0x18] sm:$0xff]  ;;  %v1272_v46 = vld [vmem:[%s2657_s7 + $0x20] sm:$0xff] }
 0x263   :  { %v2036_v45 = vpack.c.bf16 %v1271_v44, %v1270_v42 }
 0x264   :  { %v814_v49 = vmax.f32 %v813_v47, 0.0  ;;  %v1273_v47 = vld [vmem:[%s2657_s7 + $0x28] sm:$0xff] }
 0x265   :  { %v2039_v48 = vpack.c.bf16 %v1273_v47, %v1272_v46 }
 0x266   :  { %1858 = vmatmul.mubr.msk.f32.vlgmr.msra.gmra.mrb[24].mxu0 %vm476_vm4, %v814_v49  ;;  %v1274_v49 = vld [vmem:[%s2657_s7 + $0x30] sm:$0xff] }
 0x267   :  { %1879 = vmatpush3.bf16.msra.mxu0 %v2119_v1  ;;  %1892 = vmatprep.mubr.msk.bf16.mxu0 %vm2062_vm0, %v2061_v0 }
 0x268   :  { %1880 = vmatprep.subr.bf16.mxu0 %v2061_v0 }
 0x26b   :  { %1881 = vmatpush3.bf16.msra.mxu0 %v2130_v2 }
 0x26c   :  { %1882 = vmatprep.subr.bf16.mxu0 %v2061_v0 }
 0x26f   :  { %1883 = vmatpush3.bf16.msra.mxu0 %v2139_v3 }
 0x270   :  { %1884 = vmatprep.subr.bf16.mxu0 %v2061_v0 }
 0x273   :  { %1885 = vmatpush3.bf16.msra.mxu0 %v2148_v4 }
 0x274   :  { %1886 = vmatprep.subr.bf16.mxu0 %v2061_v0 }
 0x277   :  { %1887 = vmatpush3.bf16.msra.mxu0 %v2157_v5 }
 0x278   :  { %1888 = vmatprep.subr.bf16.mxu0 %v2061_v0 }
 0x27b   :  { %1889 = vmatpush3.bf16.msra.mxu0 %v2166_v6 }
 0x27c   :  { %1890 = vmatprep.subr.bf16.mxu0 %v2061_v0 }
 0x27f   :  { %1891 = vmatpush3.bf16.msra.mxu0 %v2177_v8 }
 0x280   :  { %1914 = vmatprep.subr.bf16.mxu0 %v2061_v0 }
 0x282   :  { %1893 = vmatmul.mubr.msk.bf16.vlgmr.msra.gmra.mrb[28].mxu0 %vm90_vm2, %v1428_v50  ;;  %v1275_v50 = vld [vmem:[%s2657_s7 + $0x38] sm:$0xff] }
 0x283   :  { %1915 = vmatpush3.bf16.msra.mxu0 %v2119_v1  ;;  %1928 = vmatprep.mubr.msk.bf16.mxu0 %vm2062_vm0, %v2061_v0  ;;  %v1432_v1 = vld [vmem:[%s2653_s0 + $0x3c] sm:$0xf] }
 0x284   :  { %1916 = vmatprep.subr.bf16.mxu0 %v2061_v0 }
 0x287   :  { %1917 = vmatpush3.bf16.msra.mxu0 %v2130_v2  ;;  %v935_v2 = vpop.f32.mrb[28].mxu1 }
 0x288   :  { %1918 = vmatprep.subr.bf16.mxu0 %v2061_v0 }
 0x28b   :  { %1919 = vmatpush3.bf16.msra.mxu0 %v2139_v3  ;;  %v1876_v3 = vpop.f32.mrb[29].mxu1 }
 0x28c   :  { %1920 = vmatprep.subr.bf16.mxu0 %v2061_v0  ;;  %v1439_v3 = vld [vmem:[%s2658_s4] ss:$0 sm:$0xff] }
 0x28f   :  { %1921 = vmatpush3.bf16.msra.mxu0 %v2148_v4  ;;  %v938_v4 = vpop.f32.mrb[30].mxu1 }
 0x290   :  { %1922 = vmatprep.subr.bf16.mxu0 %v2061_v0 }
 0x293   :  { %1923 = vmatpush3.bf16.msra.mxu0 %v2157_v5  ;;  %v1877_v5 = vpop.f32.mrb[31].mxu1 }
 0x294   :  { %1924 = vmatprep.subr.bf16.mxu0 %v2061_v0 }
 0x297   :  { %1925 = vmatpush3.bf16.msra.mxu0 %v2166_v6  ;;  %v1026_v6 = vpop.f32.mrb[32].mxu1 }
 0x298   :  { %1926 = vmatprep.subr.bf16.mxu0 %v2061_v0  ;;  %v1912_v51 = vpop.f32.mrb[33].mxu1 }
 0x299   :  { %v1029_v53 = vpop.f32.mrb[34].mxu1 }
 0x29a   :  { %v1913_v55 = vpop.f32.mrb[35].mxu1  ;;  %v1278_v53 = vld [vmem:[%s2657_s7 + $0x50] sm:$0xf] }
 0x29b   :  { %1927 = vmatpush3.bf16.msra.mxu0 %v2177_v8  ;;  %v1434_v8 = vld [vmem:[%s2654_s3 + $0x48] sm:$0xff] }
 0x29c   :  { %2011 = vmatprep.subr.bf16.mxu0 %v2063_v20  ;;  %v2009_v54 = vpack.c.bf16 %v1435_v52, %v1434_v8  ;;  %v1276_v8 = vld [vmem:[%s2657_s7 + $0x40] sm:$0xff]  ;;  %v1277_v52 = vld [vmem:[%s2657_s7 + $0x48] sm:$0xff] }
 0x29e   :  { %1929 = vmatmul.mubr.msk.bf16.vlgmr.msra.gmra.mrb[32].mxu0 %vm90_vm2, %v1432_v1  ;;  %2010 = vmatpush3.bf16.msra.mxu1 %v2009_v54  ;;  %v2042_v1 = vpack.c.bf16 %v1275_v50, %v1274_v49  ;;  %v1440_v54 = vld [vmem:[%s2659_s6] ss:$0 sm:$0xff] }
 0x29f   :  { %1971 = vmatprep.mubr.msk.f32.mxu0 %vm2062_vm0, %v2061_v0  ;;  %1936 = vmatprep.subr.mxu1 %v2061_v0 }
 0x2a0   :  { %2013 = vmatpush3.bf16.msra.mxu0 %v2012_v60 }
 0x2a1   :  { %2014 = vmatprep.subr.bf16.mxu0 %v2063_v20 }
 0x2a2   :  { %1937 = vmatpush3.msk.msra.mxu1 %vm480_vm3, %v1436_v56 }
 0x2a3   :  { %2032 = vmatprep.subr.bf16.mxu1 %v2063_v20 }
 0x2a4   :  { %2016 = vmatpush3.bf16.msra.mxu0 %v2015_v62 }
 0x2a5   :  { %2017 = vmatprep.subr.bf16.mxu0 %v2063_v20 }
 0x2a8   :  { %2019 = vmatpush3.bf16.msra.mxu0 %v2018_v10 }
 0x2a9   :  { %2020 = vmatprep.subr.bf16.mxu0 %v2063_v20 }
 0x2ac   :  { %2022 = vmatpush3.bf16.msra.mxu0 %v2021_v13 }
 0x2ad   :  { %2023 = vmatprep.subr.bf16.mxu0 %v2063_v20 }
 0x2b0   :  { %2025 = vmatpush3.bf16.msra.mxu0 %v2024_v16 }
 0x2b1   :  { %2026 = vmatprep.subr.bf16.mxu0 %v2063_v20 }
 0x2b4   :  { %2028 = vmatpush3.bf16.msra.mxu0 %v2027_v19 }
 0x2b5   :  { %2029 = vmatprep.subr.bf16.mxu0 %v2063_v20 }
 0x339   :  { %v891_v21 = vpop.f32.mrb[24].mxu0 }
 0x33a   :  { %v895_v22 = vadd.f32 %v891_v21, %v2484_v35  ;;  %v1859_v23 = vpop.f32.mrb[25].mxu0  ;;  %v1183_v35 = vld [vmem:[%s2656_s5 + $0x60] sm:$0xff] }
 0x33b   :  { %v2030_v39 = vpack.c.bf16 %v1184_v38, %v1183_v35 }
 0x33d   :  { %2031 = vmatpush3.bf16.msra.mxu0 %v2030_v39 }
 0x33e   :  { %1969 = vmatprep.subr.mxu0 %v2061_v0 }
 0x355   :  { %v980_v24 = vpop.f32.mrb[28].mxu0 }
 0x356   :  { %v986_v25 = vmax.f32 %v935_v2, %v980_v24  ;;  %v1894_v26 = vpop.f32.mrb[29].mxu0 }
 0x357   :  { %v983_v27 = vpop.f32.mrb[30].mxu0 }
 0x358   :  { %v1032_v28 = vmax.f32 %v986_v25, %v1026_v6  ;;  %v1895_v29 = vpop.f32.mrb[31].mxu0 }
 0x371   :  { %v1072_v30 = vpop.f32.mrb[32].mxu0 }
 0x372   :  { %v1078_v31 = vmax.f32 %v1032_v28, %v1072_v30  ;;  %v1930_v32 = vpop.f32.mrb[33].mxu0 }
 0x373   :  { %v1075_v33 = vpop.f32.mrb[34].mxu0 }
 0x374   :  { %v1079_v34 = vadd.f32 %v2376_v7, %v1078_v31  ;;  %v1931_v36 = vpop.f32.mrb[35].mxu0  ;;  %v1185_v7 = vld [vmem:[%s2656_s5 + $0x70] sm:$0xff] }
 0x375   :  { %1970 = vmatpush3.msra.mxu0 %v1185_v7 }
 0x376   :  { %v1080_v37 = vmax.f32 %v1079_v34, 0.0 }
 0x378   :  { %1939 = vmatmul.mubr.msk.f32.vlgmr.msra.gmra.mrb[36].mxu1 %vm476_vm4, %v1080_v37 }
 0x379   :  { %1996 = vmatprep.mubr.msk.f32.mxu1 %vm2062_vm0, %v2061_v0  ;;  %2034 = vmatpush3.bf16.msra.mxu1 %v2033_v43 }
 0x37a   :  { %2035 = vmatprep.subr.bf16.mxu1 %v2063_v20 }
 0x37d   :  { %2037 = vmatpush3.bf16.msra.mxu1 %v2036_v45 }
 0x37e   :  { %2038 = vmatprep.subr.bf16.mxu1 %v2063_v20 }
 0x381   :  { %2040 = vmatpush3.bf16.msra.mxu1 %v2039_v48 }
 0x382   :  { %2041 = vmatprep.subr.bf16.mxu1 %v2063_v20 }
 0x385   :  { %2043 = vmatpush3.bf16.msra.mxu1 %v2042_v1 }
 0x386   :  { %2044 = vmatprep.subr.bf16.mxu1 %v2063_v20  ;;  %v2045_v20 = vpack.c.bf16 %v1277_v52, %v1276_v8 }
 0x389   :  { %2046 = vmatpush3.bf16.msra.mxu1 %v2045_v20 }
 0x38a   :  { %1994 = vmatprep.subr.mxu1 %v2061_v0  ;;  %v1442_v0 = vld [vmem:[%s2660_s8] ss:$0 sm:$0xff] }
 0x38d   :  { %1995 = vmatpush3.msk.msra.mxu1 %vm1290_vm6, %v1278_v53 }
 0x44b   :  { %v1157_v2 = vpop.f32.mrb[36].mxu1 }
 0x44c   :  { %v1161_v4 = vadd.f32 %v1157_v2, %v895_v22  ;;  %v1940_v5 = vpop.f32.mrb[37].mxu1 }
 0x44e   :  { %v1169_v6 = vadd.f32 %v1439_v3, %v1161_v4 }
 0x450   :  { %v1170_v51 = vmax.f32 %v1169_v6, 0.0 }
 0x452   :  { %1972 = vmatmul.mubr.msk.f32.vlgmr.msra.gmra.mrb[26].mxu0 %vm1193_vm5, %v1170_v51 }
 0x525   :  { %v1263_v55 = vpop.f32.mrb[26].mxu0 }
 0x526   :  { %v1264_v56 = vadd.f32 %v1440_v54, %v1263_v55  ;;  %v1973_v57 = vpop.f32.mrb[27].mxu0 }
 0x528   :  { %v1267_v58 = vmax.f32 %v1264_v56, 0.0 }
 0x52a   :  { %1997 = vmatmul.mubr.msk.f32.vlgmr.msra.gmra.mrb[38].mxu1 %vm1286_vm7, %v1267_v58 }
 0x5fd   :  { %v1360_v59 = vpop.f32.mrb[38].mxu1 }
 0x5fe   :  { %v1361_v60 = vadd.f32 %v1442_v0, %v1360_v59  ;;  %v1998_v61 = vpop.f32.mrb[39].mxu1 }
 0x600   :  { %v1365_v62 = vsel %vm1364_vm8, %v1361_v60, -inf }
 0x601   :  { %1366 = vmax.xlane.f32.xlu0 %v1365_v62 }
 0x68e   :  { %v1367_v63 = vpop.xlane.xlu0 %1366 }
 0x68f   :  { %v1368_v9 = vsub.f32 %v1361_v60, %v1367_v63 }
 0x691   :  { %v1369_v10 = vmul.f32 1.442695, %v1368_v9 }
 0x693   :  { %2057 = vpow2.f32 %v1369_v10 }
 0x69d   :  { %v2058_v11 = vpop.eup %2057 }
 0x69e   :  { %v1371_v12 = vsel %vm1364_vm8, %v2058_v11, 0.0 }
 0x69f   :  { %1372 = vadd.xlane.f32.xlu0 %v1371_v12 }
 0x72c   :  { %v1373_v13 = vpop.xlane.xlu0 %1372 }
 0x72d   :  { %2059 = vlog2.f32 %v1373_v13 }
 0x737   :  { %v2060_v14 = vpop.eup %2059 }
 0x738   :  { %v1375_v15 = vmul.f32 0.6931472, %v2060_v14 }
 0x73a   :  { %v1376_v16 = vadd.f32 %v1375_v15, %v1367_v63 }
 0x73c   :  { %v1377_v17 = vsub.f32 %v1361_v60, %v1376_v16 }
 0x73e   :  { %1378 = vst.msk [vmem:[%s2661_s9] sm:$0xff] %vm1364_vm8, %v1377_v17 }

</bundles_post_ra>
